<compile_context>
chip_gen: v5e
topology: v5e:2x2
jax: 0.10.0
libtpu: 0.0.40
codegen_flags: <defaults>
</compile_context>

<pallas_src>
import functools

import jax
import jax.numpy as jnp
from jax.experimental import pallas as pl
from jax.experimental.pallas import tpu as pltpu

BN_EPS = 1e-5


def _local_att_kernel(x_ref, pool_ref, w1_ref, sc_ref, b_ref, w2_ref,
                      eh_ref, ew_ref, o_ref):
    """One batch tile.  x_ref/o_ref: (TB*C, H*W) lane-dense blocks in the I/O dtype."""
    H = eh_ref.shape[0]
    tbc = x_ref.shape[0]                       # TB * C rows in this block

    x = x_ref[...]                             # (TB*C, HW), never upcast

    # Pooling: one MXU pass against an exact 0/1 selection matrix, f32 accumulation.
    pooled = jnp.dot(x, pool_ref[...],
                     preferred_element_type=jnp.float32)        # (TB*C, H+W)

    # BN-folded 1x1 conv, fused across the batch tile (block-diagonal weight),
    # then the 1/W,1/H pooling scale (row) + folded BN bias (column) + ReLU.
    y = jnp.dot(w1_ref[...], pooled,
                preferred_element_type=jnp.float32)             # (TB*mid, H+W)
    y = jnp.maximum(y * sc_ref[...] + b_ref[...], 0.0)

    # Fused F_h / F_w projection: one MXU pass, then split + sigmoid.
    z = jnp.dot(w2_ref[...], y,
                preferred_element_type=jnp.float32)             # (2*TB*C, H+W)
    s_h = jax.nn.sigmoid(z[:tbc, :H]).astype(o_ref.dtype)       # (TB*C, H)
    s_w = jax.nn.sigmoid(z[tbc:, H:]).astype(o_ref.dtype)       # (TB*C, W)

    # Expand gates back to the lane-dense (TB*C, H*W) layout with 0/1 selection
    # matmuls (exact copies on the MXU) — no XLU transpose on the serial tail.
    g_h = jnp.dot(s_h, eh_ref[...], preferred_element_type=o_ref.dtype)
    g_w = jnp.dot(s_w, ew_ref[...], preferred_element_type=o_ref.dtype)

    o_ref[...] = x * g_h * g_w


def _plan(B, C, HW, dtype):
    """Pick a batch tile TB and a VMEM limit from the actual (padded) block bytes."""
    try:
        cap = int(pltpu.get_tpu_info().vmem_capacity_bytes)     # 64 MiB v7x, 128 MiB v5e/v6e
    except Exception:
        cap = 64 * 1024 * 1024                                  # conservative (v7x) fallback
    itemsize = jnp.dtype(dtype).itemsize
    c_pad = ((C + 7) // 8) * 8
    hw_pad = ((HW + 127) // 128) * 128
    blk = c_pad * hw_pad * itemsize            # one batch element of x (== out)
    # x + out double-buffered (4x) + gate transients (~2x) + f32 intermediates margin.
    per_elem = 7 * blk
    budget = int(cap * 0.55)
    tb = max(1, min(B, budget // max(per_elem, 1)))
    while B % tb:                              # TB must divide B (no ragged last block)
        tb -= 1
    need = tb * per_elem + (4 << 20)           # + weights / selection-matrix headroom
    vmem_limit = max(32 << 20, min(int(cap * 0.9), need))
    return tb, vmem_limit


def local_att_pallas(x, w1, wh, ww, gamma, beta, rmean, rvar):
    """x: (B, C, H, W) NCHW (torch layout).  w1: (mid, C); wh, ww: (C, mid);
    BN params (inference running stats): (mid,).  Returns (B, C, H, W)."""
    B, C, H, W = x.shape
    mid = w1.shape[0]
    HW = H * W
    HP = H + W
    dt = x.dtype
    f32 = jnp.float32

    # ---- fold inference-mode BatchNorm into the first 1x1 conv ----
    bn_scale = gamma.astype(f32) * jax.lax.rsqrt(rvar.astype(f32) + BN_EPS)   # (mid,)
    w1f = w1.astype(f32) * bn_scale[:, None]                                  # (mid, C)
    bias = beta.astype(f32) - rmean.astype(f32) * bn_scale                    # (mid,)

    # ---- batch tile / per-chip VMEM planning ----
    tb, vmem_limit = _plan(B, C, HW, dt)
    if tb != B and (tb * C) % 8 != 0:
        tb = B   # block rows must be sublane-aligned unless the block covers the array

    # ---- batch-fused (block-diagonal) weights so every matmul in-kernel is 2-D ----
    eye = jnp.eye(tb, dtype=f32)
    w1_big = jnp.kron(eye, w1f)                                    # (tb*mid, tb*C)
    w2_big = jnp.concatenate([jnp.kron(eye, wh.astype(f32)),
                              jnp.kron(eye, ww.astype(f32))],
                             axis=0)                               # (2*tb*C, tb*mid)
    bias_big = jnp.tile(bias.reshape(mid, 1), (tb, 1))             # (tb*mid, 1)

    # ---- exact 0/1 selection matrices (kept in the I/O dtype; no precision loss) ----
    l = jnp.arange(HW)
    sel_h = (l[:, None] // W == jnp.arange(H)[None, :]).astype(dt)  # (HW, H)
    sel_w = (l[:, None] % W == jnp.arange(W)[None, :]).astype(dt)   # (HW, W)
    pool = jnp.concatenate([sel_h, sel_w], axis=1)                  # (HW, H+W)
    # 1/W, 1/H pooling scale applied as a row on y (post-conv; algebraically identical).
    scale_row = jnp.concatenate([jnp.full((1, H), 1.0 / W, f32),
                                 jnp.full((1, W), 1.0 / H, f32)], axis=1)   # (1, H+W)
    exp_h = sel_h.T                                                 # (H, HW)
    exp_w = sel_w.T                                                 # (W, HW)

    x_flat = x.reshape(B * C, HW)    # free, lane-dense view (W is innermost in NCHW)

    out = pl.pallas_call(
        _local_att_kernel,
        out_shape=jax.ShapeDtypeStruct((B * C, HW), dt),
        grid=(B // tb,),
        in_specs=[
            pl.BlockSpec((tb * C, HW), lambda b: (b, 0)),            # x (lane-dense)
            pl.BlockSpec((HW, HP), lambda b: (0, 0)),                # pooling selector
            pl.BlockSpec((tb * mid, tb * C), lambda b: (0, 0)),      # BN-folded 1x1 conv
            pl.BlockSpec((1, HP), lambda b: (0, 0)),                 # 1/W,1/H pooling scale
            pl.BlockSpec((tb * mid, 1), lambda b: (0, 0)),           # BN-folded bias
            pl.BlockSpec((2 * tb * C, tb * mid), lambda b: (0, 0)),  # fused F_h / F_w
            pl.BlockSpec((H, HW), lambda b: (0, 0)),                 # h-gate expansion
            pl.BlockSpec((W, HW), lambda b: (0, 0)),                 # w-gate expansion
        ],
        out_specs=pl.BlockSpec((tb * C, HW), lambda b: (b, 0)),
        compiler_params=pltpu.CompilerParams(
            dimension_semantics=("parallel",),
            vmem_limit_bytes=vmem_limit),
    )(x_flat, pool, w1_big, scale_row, bias_big, w2_big, exp_h, exp_w)

    return out.reshape(B, C, H, W)


def local_att_ref(x, w1, wh, ww, gamma, beta, rmean, rvar):
    """Pure-JAX reference with torch semantics (NCHW, unfolded BN)."""
    H = x.shape[2]
    x_h = jnp.mean(x, axis=3)                                  # (B, C, H)
    x_w = jnp.mean(x, axis=2)                                  # (B, C, W)
    pooled = jnp.concatenate([x_h, x_w], axis=2)               # (B, C, H+W)
    y = jnp.einsum('mc,bcl->bml', w1, pooled)                  # (B, mid, H+W)
    scale = gamma / jnp.sqrt(rvar + BN_EPS)
    bias = beta - rmean * scale
    y = jnp.maximum(y * scale[None, :, None] + bias[None, :, None], 0.0)
    s_h = jax.nn.sigmoid(jnp.einsum('cm,bml->bcl', wh, y[:, :, :H]))   # (B, C, H)
    s_w = jax.nn.sigmoid(jnp.einsum('cm,bml->bcl', ww, y[:, :, H:]))   # (B, C, W)
    return x * s_h[:, :, :, None] * s_w[:, :, None, :]


if __name__ == "__main__":
    B, C, H, W = 2, 64, 16, 16
    reduction = 16
    mid = C // reduction

    key = jax.random.PRNGKey(0)
    kx, k1, k2, k3, kg, kb, km, kv = jax.random.split(key, 8)

    x = jax.random.normal(kx, (B, C, H, W), dtype=jnp.float32)
    # torch-like conv weights (kernel-size-1 squeezed): conv_1x1 (mid, C), F_h/F_w (C, mid)
    w1 = jax.random.normal(k1, (mid, C), dtype=jnp.float32) * 0.2
    wh = jax.random.normal(k2, (C, mid), dtype=jnp.float32) * 0.2
    ww = jax.random.normal(k3, (C, mid), dtype=jnp.float32) * 0.2
    # BatchNorm parameters / running statistics (deterministic, non-trivial)
    gamma = 1.0 + 0.1 * jax.random.normal(kg, (mid,), dtype=jnp.float32)
    beta = 0.1 * jax.random.normal(kb, (mid,), dtype=jnp.float32)
    rmean = 0.1 * jax.random.normal(km, (mid,), dtype=jnp.float32)
    rvar = jnp.abs(1.0 + 0.1 * jax.random.normal(kv, (mid,), dtype=jnp.float32))

    out = local_att_pallas(x, w1, wh, ww, gamma, beta, rmean, rvar)
    out = jax.block_until_ready(out)

    ref = local_att_ref(x, w1, wh, ww, gamma, beta, rmean, rvar)
    assert out.shape == (B, C, H, W)
    assert jnp.allclose(out, ref, atol=1e-4, rtol=1e-4), (
        float(jnp.max(jnp.abs(out - ref))))

    print("KERNEL_OK")
</pallas_src>

<mosaic_0001>
module attributes {stable_mosaic.version = 11 : i64} {
  func.func @_local_att_kernel(%arg0: i32, %arg1: memref<128x256xf32, #tpu.memory_space<vmem>>, %arg2: memref<256x32xf32, #tpu.memory_space<vmem>>, %arg3: memref<8x128xf32, #tpu.memory_space<vmem>>, %arg4: memref<1x32xf32, #tpu.memory_space<vmem>>, %arg5: memref<8x1xf32, #tpu.memory_space<vmem>>, %arg6: memref<256x8xf32, #tpu.memory_space<vmem>>, %arg7: memref<16x256xf32, #tpu.memory_space<vmem>>, %arg8: memref<16x256xf32, #tpu.memory_space<vmem>>, %arg9: memref<128x256xf32, #tpu.memory_space<vmem>>) attributes {dimension_semantics = [#tpu.dimension_semantics<parallel>], iteration_bounds = array<i64: 1>, scalar_prefetch = 0 : i64, scratch_operands = 0 : i64, tpu.core_type = #tpu.core_type<tc>, window_params = [{transform_indices = @transform_0, window_bounds = array<i64: 128, 256>}, {pipeline_mode = #tpu.pipeline_mode<synchronous>, transform_indices = @transform_1, window_bounds = array<i64: 256, 32>}, {pipeline_mode = #tpu.pipeline_mode<synchronous>, transform_indices = @transform_2, window_bounds = array<i64: 8, 128>}, {pipeline_mode = #tpu.pipeline_mode<synchronous>, transform_indices = @transform_3, window_bounds = array<i64: 1, 32>}, {pipeline_mode = #tpu.pipeline_mode<synchronous>, transform_indices = @transform_4, window_bounds = array<i64: 8, 1>}, {pipeline_mode = #tpu.pipeline_mode<synchronous>, transform_indices = @transform_5, window_bounds = array<i64: 256, 8>}, {pipeline_mode = #tpu.pipeline_mode<synchronous>, transform_indices = @transform_6, window_bounds = array<i64: 16, 256>}, {pipeline_mode = #tpu.pipeline_mode<synchronous>, transform_indices = @transform_7, window_bounds = array<i64: 16, 256>}, {transform_indices = @transform_8, window_bounds = array<i64: 128, 256>}]} {
    %c0 = arith.constant 0 : index
    %c0_0 = arith.constant 0 : index
    %0 = vector.load %arg1[%c0, %c0_0] : memref<128x256xf32, #tpu.memory_space<vmem>>, vector<128x256xf32>
    %c0_1 = arith.constant 0 : index
    %c0_2 = arith.constant 0 : index
    %1 = vector.load %arg2[%c0_1, %c0_2] : memref<256x32xf32, #tpu.memory_space<vmem>>, vector<256x32xf32>
    %cst = arith.constant dense<0.000000e+00> : vector<128x32xf32>
    %2 = tpu.matmul %0, %1, %cst {dimension_numbers = #tpu.dot_dimension_numbers<[1], [0], [0], [1], [0, 0, 1, 1], [], []>} : vector<128x256xf32>, vector<256x32xf32>, vector<128x32xf32> -> vector<128x32xf32>
    %c0_3 = arith.constant 0 : index
    %c0_4 = arith.constant 0 : index
    %3 = vector.load %arg3[%c0_3, %c0_4] : memref<8x128xf32, #tpu.memory_space<vmem>>, vector<8x128xf32>
    %cst_5 = arith.constant dense<0.000000e+00> : vector<8x32xf32>
    %4 = tpu.matmul %3, %2, %cst_5 {dimension_numbers = #tpu.dot_dimension_numbers<[1], [0], [0], [1], [0, 0, 1, 1], [], []>} : vector<8x128xf32>, vector<128x32xf32>, vector<8x32xf32> -> vector<8x32xf32>
    %c0_6 = arith.constant 0 : index
    %c0_7 = arith.constant 0 : index
    %5 = vector.load %arg4[%c0_6, %c0_7] : memref<1x32xf32, #tpu.memory_space<vmem>>, vector<1x32xf32>
    %6 = vector.broadcast %5 : vector<1x32xf32> to vector<8x32xf32>
    %7 = arith.mulf %4, %6 : vector<8x32xf32>
    %c0_8 = arith.constant 0 : index
    %c0_9 = arith.constant 0 : index
    %8 = vector.load %arg5[%c0_8, %c0_9] : memref<8x1xf32, #tpu.memory_space<vmem>>, vector<8x1xf32>
    %9 = vector.broadcast %8 : vector<8x1xf32> to vector<8x32xf32>
    %10 = arith.addf %7, %9 : vector<8x32xf32>
    %cst_10 = arith.constant 0.000000e+00 : f32
    %11 = vector.broadcast %cst_10 : f32 to vector<8x32xf32>
    %12 = arith.maximumf %10, %11 : vector<8x32xf32>
    %c0_11 = arith.constant 0 : index
    %c0_12 = arith.constant 0 : index
    %13 = vector.load %arg6[%c0_11, %c0_12] : memref<256x8xf32, #tpu.memory_space<vmem>>, vector<256x8xf32>
    %cst_13 = arith.constant dense<0.000000e+00> : vector<256x32xf32>
    %14 = tpu.matmul %13, %12, %cst_13 {dimension_numbers = #tpu.dot_dimension_numbers<[1], [0], [0], [1], [0, 0, 1, 1], [], []>} : vector<256x8xf32>, vector<8x32xf32>, vector<256x32xf32> -> vector<256x32xf32>
    %15 = vector.extract_strided_slice %14 {offsets = [0, 0], sizes = [128, 16], strides = [1, 1]} : vector<256x32xf32> to vector<128x16xf32>
    %16 = arith.negf %15 : vector<128x16xf32>
    %17 = math.exp %16 : vector<128x16xf32>
    %cst_14 = arith.constant 1.000000e+00 : f32
    %18 = vector.broadcast %cst_14 : f32 to vector<128x16xf32>
    %19 = arith.addf %18, %17 : vector<128x16xf32>
    %20 = arith.divf %18, %19 : vector<128x16xf32>
    %21 = vector.extract_strided_slice %14 {offsets = [128, 16], sizes = [128, 16], strides = [1, 1]} : vector<256x32xf32> to vector<128x16xf32>
    %22 = arith.negf %21 : vector<128x16xf32>
    %23 = math.exp %22 : vector<128x16xf32>
    %cst_15 = arith.constant 1.000000e+00 : f32
    %24 = vector.broadcast %cst_15 : f32 to vector<128x16xf32>
    %25 = arith.addf %24, %23 : vector<128x16xf32>
    %26 = arith.divf %24, %25 : vector<128x16xf32>
    %c0_16 = arith.constant 0 : index
    %c0_17 = arith.constant 0 : index
    %27 = vector.load %arg7[%c0_16, %c0_17] : memref<16x256xf32, #tpu.memory_space<vmem>>, vector<16x256xf32>
    %cst_18 = arith.constant dense<0.000000e+00> : vector<128x256xf32>
    %28 = tpu.matmul %20, %27, %cst_18 {dimension_numbers = #tpu.dot_dimension_numbers<[1], [0], [0], [1], [0, 0, 1, 1], [], []>} : vector<128x16xf32>, vector<16x256xf32>, vector<128x256xf32> -> vector<128x256xf32>
    %c0_19 = arith.constant 0 : index
    %c0_20 = arith.constant 0 : index
    %29 = vector.load %arg8[%c0_19, %c0_20] : memref<16x256xf32, #tpu.memory_space<vmem>>, vector<16x256xf32>
    %cst_21 = arith.constant dense<0.000000e+00> : vector<128x256xf32>
    %30 = tpu.matmul %26, %29, %cst_21 {dimension_numbers = #tpu.dot_dimension_numbers<[1], [0], [0], [1], [0, 0, 1, 1], [], []>} : vector<128x16xf32>, vector<16x256xf32>, vector<128x256xf32> -> vector<128x256xf32>
    %31 = arith.mulf %0, %28 : vector<128x256xf32>
    %32 = arith.mulf %31, %30 : vector<128x256xf32>
    %c0_22 = arith.constant 0 : index
    %c0_23 = arith.constant 0 : index
    %33 = vector.load %arg9[%c0_22, %c0_23] : memref<128x256xf32, #tpu.memory_space<vmem>>, vector<128x256xf32>
    tpu.vector_store %arg9[%c0_22, %c0_23], %32 {strides = array<i32>} : memref<128x256xf32, #tpu.memory_space<vmem>>, vector<128x256xf32>,
    return
  }
  func.func @transform_0(%arg0: i32) -> (i32, i32) {
    %c0_i32 = arith.constant 0 : i32
    %c0_i32_0 = arith.constant 0 : i32
    return %arg0, %c0_i32 : i32, i32
  }
  func.func @transform_1(%arg0: i32) -> (i32, i32) {
    %c0_i32 = arith.constant 0 : i32
    %c0_i32_0 = arith.constant 0 : i32
    %c0_i32_1 = arith.constant 0 : i32
    return %c0_i32, %c0_i32_0 : i32, i32
  }
  func.func @transform_2(%arg0: i32) -> (i32, i32) {
    %c0_i32 = arith.constant 0 : i32
    %c0_i32_0 = arith.constant 0 : i32
    %c0_i32_1 = arith.constant 0 : i32
    return %c0_i32, %c0_i32_0 : i32, i32
  }
  func.func @transform_3(%arg0: i32) -> (i32, i32) {
    %c0_i32 = arith.constant 0 : i32
    %c0_i32_0 = arith.constant 0 : i32
    %c0_i32_1 = arith.constant 0 : i32
    return %c0_i32, %c0_i32_0 : i32, i32
  }
  func.func @transform_4(%arg0: i32) -> (i32, i32) {
    %c0_i32 = arith.constant 0 : i32
    %c0_i32_0 = arith.constant 0 : i32
    %c0_i32_1 = arith.constant 0 : i32
    return %c0_i32, %c0_i32_0 : i32, i32
  }
  func.func @transform_5(%arg0: i32) -> (i32, i32) {
    %c0_i32 = arith.constant 0 : i32
    %c0_i32_0 = arith.constant 0 : i32
    %c0_i32_1 = arith.constant 0 : i32
    return %c0_i32, %c0_i32_0 : i32, i32
  }
  func.func @transform_6(%arg0: i32) -> (i32, i32) {
    %c0_i32 = arith.constant 0 : i32
    %c0_i32_0 = arith.constant 0 : i32
    %c0_i32_1 = arith.constant 0 : i32
    return %c0_i32, %c0_i32_0 : i32, i32
  }
  func.func @transform_7(%arg0: i32) -> (i32, i32) {
    %c0_i32 = arith.constant 0 : i32
    %c0_i32_0 = arith.constant 0 : i32
    %c0_i32_1 = arith.constant 0 : i32
    return %c0_i32, %c0_i32_0 : i32, i32
  }
  func.func @transform_8(%arg0: i32) -> (i32, i32) {
    %c0_i32 = arith.constant 0 : i32
    %c0_i32_0 = arith.constant 0 : i32
    return %arg0, %c0_i32 : i32, i32
  }
}

</mosaic_0001>

<bundles_post_ra>
// kernel: tpu_custom_call.1
= control target key start
LH: loop header
LB: loop body
LE: loop exit
PB: predicated region body
PF: predicated region fallthrough
CT: control target
= control target key end

     0   :  { %s2575_s0 = inlined_call_operand.vmem [shape: f32[128,256], index: 0, kind: input, shape index: {}]   ;;  %s2576_s1 = inlined_call_operand.vmem [shape: f32[256,32], index: 1, kind: input, shape index: {}]   ;;  %s2577_s2 = inlined_call_operand.vmem [shape: f32[8,128], index: 2, kind: input, shape index: {}]   ;;  %s2578_s3 = inlined_call_operand.vmem [shape: f32[1,32], index: 3, kind: input, shape index: {}]   ;;  %s2579_s4 = inlined_call_operand.vmem [shape: f32[8,1], index: 4, kind: input, shape index: {}]   ;;  %s2580_s5 = inlined_call_operand.vmem [shape: f32[256,8], index: 5, kind: input, shape index: {}]   ;;  %s2581_s6 = inlined_call_operand.vmem [shape: f32[16,256], index: 6, kind: input, shape index: {}]   ;;  %s2582_s7 = inlined_call_operand.vmem [shape: f32[16,256], index: 7, kind: input, shape index: {}]   ;;  %s2583_s8 = inlined_call_operand.hbm [shape: f32[128,256], index: 8, kind: output, shape index: {}]  }
   0x1   :  { %v77_v0 = vld [vmem:[%s2576_s1 + $0x78] sm:$0xff]  ;;  %v76_v2 = vld [vmem:[%s2576_s1 + $0x70] sm:$0xff]  ;;  %v75_v4 = vld [vmem:[%s2576_s1 + $0x68] sm:$0xff] }
   0x2   :  { %v93_v1 = vld [vmem:[%s2576_s1 + $0xf8] sm:$0xff]  ;;  %94 = vmatpush.msra.mxu0 %v77_v0  ;;  %v92_v3 = vld [vmem:[%s2576_s1 + $0xf0] sm:$0xff]  ;;  %v91_v5 = vld [vmem:[%s2576_s1 + $0xe8] sm:$0xff] }
   0x3   :  { %159 = vmatpush.msra.mxu1 %v93_v1  ;;  %v74_v6 = vld [vmem:[%s2576_s1 + $0x60] sm:$0xff]  ;;  %v73_v8 = vld [vmem:[%s2576_s1 + $0x58] sm:$0xff]  ;;  %v72_v10 = vld [vmem:[%s2576_s1 + $0x50] sm:$0xff] }
   0x4   :  { %95 = vmatpush.msra.mxu0 %v76_v2  ;;  %v90_v7 = vld [vmem:[%s2576_s1 + $0xe0] sm:$0xff]  ;;  %v89_v9 = vld [vmem:[%s2576_s1 + $0xd8] sm:$0xff]  ;;  %v88_v11 = vld [vmem:[%s2576_s1 + $0xd0] sm:$0xff] }
   0x5   :  { %160 = vmatpush.msra.mxu1 %v92_v3  ;;  %v71_v12 = vld [vmem:[%s2576_s1 + $0x48] sm:$0xff]  ;;  %v70_v14 = vld [vmem:[%s2576_s1 + $0x40] sm:$0xff] }
   0x6   :  { %96 = vmatpush.msra.mxu0 %v75_v4  ;;  %v87_v13 = vld [vmem:[%s2576_s1 + $0xc8] sm:$0xff]  ;;  %v86_v15 = vld [vmem:[%s2576_s1 + $0xc0] sm:$0xff] }
   0x7   :  { %161 = vmatpush.msra.mxu1 %v91_v5 }
   0x8   :  { %97 = vmatpush.msra.mxu0 %v74_v6 }
   0x9   :  { %162 = vmatpush.msra.mxu1 %v90_v7 }
   0xa   :  { %98 = vmatpush.msra.mxu0 %v73_v8 }
   0xb   :  { %163 = vmatpush.msra.mxu1 %v89_v9 }
   0xc   :  { %99 = vmatpush.msra.mxu0 %v72_v10 }
   0xd   :  { %164 = vmatpush.msra.mxu1 %v88_v11 }
   0xe   :  { %13 = vsyncpa [#allocation3], 0  ;;  %100 = vmatpush.msra.mxu0 %v71_v12  ;;  %v69_v16 = vld [vmem:[%s2576_s1 + $0x38] sm:$0xff]  ;;  %v68_v18 = vld [vmem:[%s2576_s1 + $0x30] sm:$0xff]  ;;  %vm290_vm0 = vcmask 64512   ;;  %vm1112_vm4 = vcmask 130048  }
   0xf   :  { %165 = vmatpush.msra.mxu1 %v87_v13  ;;  %v85_v17 = vld [vmem:[%s2576_s1 + $0xb8] sm:$0xff]  ;;  %v84_v19 = vld [vmem:[%s2576_s1 + $0xb0] sm:$0xff]  ;;  %v67_v20 = vld [vmem:[%s2576_s1 + $0x28] sm:$0xff]  ;;  %s1943_s21 = smov 112   ;;  %s1944_s27 = smov [#allocation2]  }
  0x10   :  { %101 = vmatpush.msra.mxu0 %v70_v14  ;;  %v83_v21 = vld [vmem:[%s2576_s1 + $0xa8] sm:$0xff]  ;;  %v66_v22 = vld [vmem:[%s2576_s1 + $0x20] sm:$0xff]  ;;  %v65_v24 = vld [vmem:[%s2576_s1 + $0x18] sm:$0xff]  ;;  %s1607_s30 = sshll.u32 %s2583_s8, 4  ;;  %s1945_s10 = smov 256   ;;  %s1608_s30 = int_to_ptr.hbm [resolvable:$true] %s1607_s30 }
  0x11   :  { %166 = vmatpush.msra.mxu1 %v86_v15  ;;  %v82_v23 = vld [vmem:[%s2576_s1 + $0xa0] sm:$0xff]  ;;  %v81_v25 = vld [vmem:[%s2576_s1 + $0x98] sm:$0xff]  ;;  %v64_v26 = vld [vmem:[%s2576_s1 + $0x10] sm:$0xff]  ;;  %s1946_s11 = smov 16  }
  0x12   :  { %102 = vmatpush.msra.mxu0 %v69_v16  ;;  %v80_v27 = vld [vmem:[%s2576_s1 + $0x90] sm:$0xff]  ;;  %v63_v28 = vld [vmem:[%s2576_s1 + $0x8] sm:$0xff]  ;;  %v62_v30 = vld [vmem:[%s2576_s1] sm:$0xff] }
  0x13   :  { %167 = vmatpush.msra.mxu1 %v85_v17  ;;  %v79_v29 = vld [vmem:[%s2576_s1 + $0x88] sm:$0xff]  ;;  %v78_v31 = vld [vmem:[%s2576_s1 + $0x80] sm:$0xff]  ;;  %v32_v34 = vld [vmem:[%s2575_s0 + $0x10] sm:$0xff] }
  0x14   :  { %103 = vmatpush.msra.mxu0 %v68_v18  ;;  %v30_v32 = vld [vmem:[%s2575_s0] sm:$0xff]  ;;  %v31_v33 = vld [vmem:[%s2575_s0 + $0x8] sm:$0xff]  ;;  %v33_v35 = vld [vmem:[%s2575_s0 + $0x18] sm:$0xff] }
  0x15   :  { %168 = vmatpush.msra.mxu1 %v84_v19  ;;  %v34_v36 = vld [vmem:[%s2575_s0 + $0x20] sm:$0xff]  ;;  %v35_v37 = vld [vmem:[%s2575_s0 + $0x28] sm:$0xff]  ;;  %v36_v38 = vld [vmem:[%s2575_s0 + $0x30] sm:$0xff] }
  0x16   :  { %104 = vmatpush.msra.mxu0 %v67_v20  ;;  %v37_v39 = vld [vmem:[%s2575_s0 + $0x38] sm:$0xff]  ;;  %v38_v40 = vld [vmem:[%s2575_s0 + $0x40] sm:$0xff]  ;;  %v39_v41 = vld [vmem:[%s2575_s0 + $0x48] sm:$0xff] }
  0x17   :  { %169 = vmatpush.msra.mxu1 %v83_v21  ;;  %v40_v42 = vld [vmem:[%s2575_s0 + $0x50] sm:$0xff]  ;;  %v41_v43 = vld [vmem:[%s2575_s0 + $0x58] sm:$0xff]  ;;  %v42_v44 = vld [vmem:[%s2575_s0 + $0x60] sm:$0xff] }
  0x18   :  { %105 = vmatpush.msra.mxu0 %v66_v22  ;;  %v43_v45 = vld [vmem:[%s2575_s0 + $0x68] sm:$0xff]  ;;  %v44_v46 = vld [vmem:[%s2575_s0 + $0x70] sm:$0xff]  ;;  %v45_v47 = vld [vmem:[%s2575_s0 + $0x78] sm:$0xff] }
  0x19   :  { %170 = vmatpush.msra.mxu1 %v82_v23  ;;  %v46_v48 = vld [vmem:[%s2575_s0 + $0x80] sm:$0xff]  ;;  %v47_v49 = vld [vmem:[%s2575_s0 + $0x88] sm:$0xff]  ;;  %v48_v50 = vld [vmem:[%s2575_s0 + $0x90] sm:$0xff] }
  0x1a   :  { %106 = vmatpush.msra.mxu0 %v65_v24  ;;  %v49_v51 = vld [vmem:[%s2575_s0 + $0x98] sm:$0xff]  ;;  %v50_v52 = vld [vmem:[%s2575_s0 + $0xa0] sm:$0xff]  ;;  %v51_v53 = vld [vmem:[%s2575_s0 + $0xa8] sm:$0xff] }
  0x1b   :  { %171 = vmatpush.msra.mxu1 %v81_v25  ;;  %v52_v54 = vld [vmem:[%s2575_s0 + $0xb0] sm:$0xff]  ;;  %v53_v55 = vld [vmem:[%s2575_s0 + $0xb8] sm:$0xff]  ;;  %v54_v56 = vld [vmem:[%s2575_s0 + $0xc0] sm:$0xff] }
  0x1c   :  { %107 = vmatpush.msra.mxu0 %v64_v26  ;;  %v55_v57 = vld [vmem:[%s2575_s0 + $0xc8] sm:$0xff]  ;;  %v56_v58 = vld [vmem:[%s2575_s0 + $0xd0] sm:$0xff]  ;;  %v57_v59 = vld [vmem:[%s2575_s0 + $0xd8] sm:$0xff] }
  0x1d   :  { %172 = vmatpush.msra.mxu1 %v80_v27  ;;  %v58_v60 = vld [vmem:[%s2575_s0 + $0xe0] sm:$0xff]  ;;  %v59_v61 = vld [vmem:[%s2575_s0 + $0xe8] sm:$0xff]  ;;  %v60_v62 = vld [vmem:[%s2575_s0 + $0xf0] sm:$0xff] }
  0x1e   :  { %108 = vmatpush.msra.mxu0 %v63_v28  ;;  %v61_v63 = vld [vmem:[%s2575_s0 + $0xf8] sm:$0xff] }
  0x1f   :  { %173 = vmatpush.msra.mxu1 %v79_v29 }
  0x20   :  { %109 = vmatpush.msra.mxu0 %v62_v30 }
  0x21   :  { %174 = vmatpush.msra.mxu1 %v78_v31  ;;  %110 = vmatmul.f32.vlgmr.msra.gmra.mxu0 %v30_v32 }
  0x22   :  { %175 = vmatmul.f32.vlgmr.msra.gmra.mxu1 %v31_v33 }
  0x29   :  { %113 = vmatmul.f32.gmra.mxu0 %v32_v34  ;;  %v250_v34 = vld [vmem:[%s2579_s4] sm:$0xff] }
  0x2a   :  { %178 = vmatmul.f32.gmra.mxu1 %v33_v35 }
  0x31   :  { %116 = vmatmul.f32.gmra.mxu0 %v34_v36  ;;  %v1942_v36 = vmov 0  }
  0x32   :  { %181 = vmatmul.f32.gmra.mxu1 %v35_v37  ;;  %1754 = vset.pattern.permute.xlu0 %v1942_v36 }
  0x33   :  { %253 = vperm.xlu0 %1754, %v250_v34  }
  0x39   :  { %119 = vmatmul.f32.gmra.mxu0 %v36_v38 }
  0x3a   :  { %184 = vmatmul.f32.gmra.mxu1 %v37_v39 }
  0x41   :  { %122 = vmatmul.f32.gmra.mxu0 %v38_v40 }
  0x42   :  { %187 = vmatmul.f32.gmra.mxu1 %v39_v41 }
  0x49   :  { %125 = vmatmul.f32.gmra.mxu0 %v40_v42 }
  0x4a   :  { %190 = vmatmul.f32.gmra.mxu1 %v41_v43 }
  0x51   :  { %128 = vmatmul.f32.gmra.mxu0 %v42_v44 }
  0x52   :  { %193 = vmatmul.f32.gmra.mxu1 %v43_v45 }
  0x59   :  { %131 = vmatmul.f32.gmra.mxu0 %v44_v46 }
  0x5a   :  { %196 = vmatmul.f32.gmra.mxu1 %v45_v47 }
  0x61   :  { %134 = vmatmul.f32.gmra.mxu0 %v46_v48 }
  0x62   :  { %199 = vmatmul.f32.gmra.mxu1 %v47_v49 }
  0x69   :  { %137 = vmatmul.f32.gmra.mxu0 %v48_v50  ;;  %v224_v50 = vld [vmem:[%s2577_s2] sm:$0xff] }
  0x6a   :  { %202 = vmatmul.f32.gmra.mxu1 %v49_v51  ;;  %v1755_v51 = vld [vmem:[%s2578_s3] ss:$0 sm:$0xff]  ;;  %s1605_s3 = sshll.u32 %s1944_s27, 4  ;;  %s1606_s3 = int_to_ptr.vmem [resolvable:$true] %s1605_s3 }
  0x71   :  { %140 = vmatmul.f32.gmra.mxu0 %v50_v52 }
  0x72   :  { %205 = vmatmul.f32.gmra.mxu1 %v51_v53 }
  0x79   :  { %143 = vmatmul.f32.gmra.mxu0 %v52_v54 }
  0x7a   :  { %208 = vmatmul.f32.gmra.mxu1 %v53_v55 }
  0x81   :  { %146 = vmatmul.f32.gmra.mxu0 %v54_v56 }
  0x82   :  { %211 = vmatmul.f32.gmra.mxu1 %v55_v57  ;;  %v258_v57 = vld [vmem:[%s2580_s5] sm:$0xff] }
  0x89   :  { %149 = vmatmul.f32.gmra.mxu0 %v56_v58  ;;  %v259_v58 = vld [vmem:[%s2580_s5 + $0x8] sm:$0xff] }
  0x8a   :  { %214 = vmatmul.f32.gmra.mxu1 %v57_v59  ;;  %v260_v59 = vld [vmem:[%s2580_s5 + $0x10] sm:$0xff] }
  0x91   :  { %152 = vmatmul.f32.gmra.mxu0 %v58_v60  ;;  %v261_v60 = vld [vmem:[%s2580_s5 + $0x18] sm:$0xff] }
  0x92   :  { %217 = vmatmul.f32.gmra.mxu1 %v59_v61  ;;  %v262_v61 = vld [vmem:[%s2580_s5 + $0x20] sm:$0xff] }
  0x99   :  { %155 = vmatmul.f32.gmra.mxu0 %v60_v62  ;;  %v263_v62 = vld [vmem:[%s2580_s5 + $0x28] sm:$0xff] }
  0x9a   :  { %220 = vmatmul.f32.gmra.mxu1 %v61_v63  ;;  %v264_v63 = vld [vmem:[%s2580_s5 + $0x30] sm:$0xff] }
  0x9e   :  { %v2184_v0 = vpop.f32.mrf.mxu0 }
  0x9f   :  { %v2186_v1 = vpop.f32.mrf.mxu1 }
  0xa0   :  { %v177_v49 = vadd.f32 %v2186_v1, %v2184_v0  ;;  %v265_v0 = vld [vmem:[%s2580_s5 + $0x38] sm:$0xff]  ;;  %v266_v1 = vld [vmem:[%s2580_s5 + $0x40] sm:$0xff] }
  0xa5   :  { %v254_v53 = vpop.permute.xlu0 %253 }
  0xa6   :  { %v114_v2 = vpop.f32.mrf.mxu0 }
  0xa7   :  { %v179_v3 = vpop.f32.mrf.mxu1 }
  0xa8   :  { %v180_v48 = vadd.f32 %v179_v3, %v114_v2  ;;  %v267_v2 = vld [vmem:[%s2580_s5 + $0x48] sm:$0xff]  ;;  %v268_v3 = vld [vmem:[%s2580_s5 + $0x50] sm:$0xff] }
  0xae   :  { %v117_v4 = vpop.f32.mrf.mxu0 }
  0xaf   :  { %v182_v5 = vpop.f32.mrf.mxu1 }
  0xb0   :  { %v183_v47 = vadd.f32 %v182_v5, %v117_v4  ;;  %v269_v4 = vld [vmem:[%s2580_s5 + $0x58] sm:$0xff]  ;;  %v270_v5 = vld [vmem:[%s2580_s5 + $0x60] sm:$0xff] }
  0xb6   :  { %v120_v6 = vpop.f32.mrf.mxu0 }
  0xb7   :  { %v185_v7 = vpop.f32.mrf.mxu1 }
  0xb8   :  { %v186_v46 = vadd.f32 %v185_v7, %v120_v6  ;;  %v271_v6 = vld [vmem:[%s2580_s5 + $0x68] sm:$0xff]  ;;  %v272_v7 = vld [vmem:[%s2580_s5 + $0x70] sm:$0xff] }
  0xbe   :  { %v123_v8 = vpop.f32.mrf.mxu0 }
  0xbf   :  { %v188_v9 = vpop.f32.mrf.mxu1 }
  0xc0   :  { %v189_v45 = vadd.f32 %v188_v9, %v123_v8  ;;  %v273_v8 = vld [vmem:[%s2580_s5 + $0x78] sm:$0xff]  ;;  %v1110_v9 = vld [vmem:[%s2581_s6 + $0x10] sm:$0xff] }
  0xc6   :  { %v126_v10 = vpop.f32.mrf.mxu0 }
  0xc7   :  { %v191_v11 = vpop.f32.mrf.mxu1 }
  0xc8   :  { %v192_v44 = vadd.f32 %v191_v11, %v126_v10  ;;  %v1111_v10 = vld [vmem:[%s2581_s6 + $0x18] sm:$0xff]  ;;  %v274_v11 = vld [vmem:[%s2580_s5 + $0x80] sm:$0xff] }
  0xc9   :  { %1240 = vmatpush.msrb.mxu0 %v1111_v10 }
  0xce   :  { %v129_v12 = vpop.f32.mrf.mxu0 }
  0xcf   :  { %v194_v13 = vpop.f32.mrf.mxu1 }
  0xd0   :  { %v195_v43 = vadd.f32 %v194_v13, %v129_v12  ;;  %v1108_v12 = vld [vmem:[%s2581_s6] sm:$0xff]  ;;  %v1109_v13 = vld [vmem:[%s2581_s6 + $0x8] sm:$0xff] }
  0xd1   :  { %1241 = vmatpush.msrb.mxu0 %v1109_v13 }
  0xd6   :  { %v132_v14 = vpop.f32.mrf.mxu0 }
  0xd7   :  { %v197_v15 = vpop.f32.mrf.mxu1 }
  0xd8   :  { %v198_v42 = vadd.f32 %v197_v15, %v132_v14 }
  0xde   :  { %v135_v16 = vpop.f32.mrf.mxu0 }
  0xdf   :  { %v200_v17 = vpop.f32.mrf.mxu1 }
  0xe0   :  { %v201_v18 = vadd.f32 %v200_v17, %v135_v16  ;;  %v275_v16 = vld [vmem:[%s2580_s5 + $0x88] sm:$0xff] }
  0xe6   :  { %v138_v19 = vpop.f32.mrf.mxu0 }
  0xe7   :  { %v203_v20 = vpop.f32.mrf.mxu1 }
  0xe8   :  { %v204_v41 = vadd.f32 %v203_v20, %v138_v19 }
  0xee   :  { %v141_v21 = vpop.f32.mrf.mxu0 }
  0xef   :  { %v206_v22 = vpop.f32.mrf.mxu1 }
  0xf0   :  { %v207_v40 = vadd.f32 %v206_v22, %v141_v21  ;;  %v276_v21 = vld [vmem:[%s2580_s5 + $0x90] sm:$0xff] }
  0xf6   :  { %v144_v23 = vpop.f32.mrf.mxu0 }
  0xf7   :  { %v209_v24 = vpop.f32.mrf.mxu1 }
  0xf8   :  { %v210_v39 = vadd.f32 %v209_v24, %v144_v23 }
  0xfe   :  { %v147_v25 = vpop.f32.mrf.mxu0 }
  0xff   :  { %v212_v26 = vpop.f32.mrf.mxu1 }
 0x100   :  { %v213_v38 = vadd.f32 %v212_v26, %v147_v25 }
 0x106   :  { %v150_v27 = vpop.f32.mrf.mxu0 }
 0x107   :  { %v215_v28 = vpop.f32.mrf.mxu1 }
 0x108   :  { %v216_v37 = vadd.f32 %v215_v28, %v150_v27  ;;  %v277_v27 = vld [vmem:[%s2580_s5 + $0x98] sm:$0xff] }
 0x10e   :  { %v153_v29 = vpop.f32.mrf.mxu0 }
 0x10f   :  { %v218_v30 = vpop.f32.mrf.mxu1 }
 0x110   :  { %v219_v35 = vadd.f32 %v218_v30, %v153_v29 }
 0x116   :  { %v156_v31 = vpop.f32.mrf.mxu0 }
 0x117   :  { %v221_v32 = vpop.f32.mrf.mxu1 }
 0x118   :  { %v222_v33 = vadd.f32 %v221_v32, %v156_v31 }
 0x11a   :  { %225 = vmatpush.msra.mxu2 %v222_v33 }
 0x11c   :  { %226 = vmatpush.msra.mxu2 %v219_v35 }
 0x11e   :  { %227 = vmatpush.msra.mxu2 %v216_v37 }
 0x120   :  { %228 = vmatpush.msra.mxu2 %v213_v38 }
 0x122   :  { %229 = vmatpush.msra.mxu2 %v210_v39  ;;  %v278_v39 = vld [vmem:[%s2580_s5 + $0xa0] sm:$0xff] }
 0x124   :  { %230 = vmatpush.msra.mxu2 %v207_v40 }
 0x126   :  { %231 = vmatpush.msra.mxu2 %v204_v41 }
 0x128   :  { %232 = vmatpush.msra.mxu2 %v201_v18 }
 0x12a   :  { %233 = vmatpush.msra.mxu2 %v198_v42 }
 0x12c   :  { %234 = vmatpush.msra.mxu2 %v195_v43 }
 0x12e   :  { %235 = vmatpush.msra.mxu2 %v192_v44 }
 0x130   :  { %236 = vmatpush.msra.mxu2 %v189_v45 }
 0x132   :  { %237 = vmatpush.msra.mxu2 %v186_v46 }
 0x134   :  { %238 = vmatpush.msra.mxu2 %v183_v47 }
 0x136   :  { %239 = vmatpush.msra.mxu2 %v180_v48 }
 0x138   :  { %240 = vmatpush.msra.mxu2 %v177_v49 }
 0x139   :  { %241 = vmatmul.f32.vlgmr.msra.gmra.mxu2 %v224_v50 }
 0x13a   :  { %1175 = vmatpush.msrb.mxu2 %v1110_v9 }
 0x13c   :  { %1176 = vmatpush.msrb.mxu2 %v1108_v12 }
 0x1bc   :  { %v242_v52 = vpop.f32.mrf.mxu2 }
 0x1bd   :  { %v249_v54 = vmul.f32 %v1755_v51, %v242_v52 }
 0x1bf   :  { %v256_v55 = vadd.f32 %v254_v53, %v249_v54  ;;  %v279_v54 = vld [vmem:[%s2580_s5 + $0xa8] sm:$0xff] }
 0x1c1   :  { %v257_v56 = vmax.f32 %v256_v55, 0.0 }
 0x1c3   :  { %402 = vmatpush.msra.mxu3 %v257_v56 }
 0x1c4   :  { %1619 = vmatmul.msk.f32.vlgmr.msra.gmra.mxu3 %vm290_vm0, %v258_v57 }
 0x1c5   :  { %1747 = vmatpush.msrb.mxu3 %v1110_v9 }
 0x1c7   :  { %1748 = vmatpush.msrb.mxu3 %v1108_v12 }
 0x1cc   :  { %1620 = vmatmul.msk.f32.gmra.mxu3 %vm290_vm0, %v259_v58 }
 0x1d4   :  { %1621 = vmatmul.msk.f32.gmra.mxu3 %vm290_vm0, %v260_v59 }
 0x1dc   :  { %1622 = vmatmul.msk.f32.gmra.mxu3 %vm290_vm0, %v261_v60 }
 0x1e4   :  { %1623 = vmatmul.msk.f32.gmra.mxu3 %vm290_vm0, %v262_v61 }
 0x1ec   :  { %1624 = vmatmul.msk.f32.gmra.mxu3 %vm290_vm0, %v263_v62 }
 0x1f4   :  { %1625 = vmatmul.msk.f32.gmra.mxu3 %vm290_vm0, %v264_v63 }
 0x1fc   :  { %1626 = vmatmul.msk.f32.gmra.mxu3 %vm290_vm0, %v265_v0 }
 0x204   :  { %1627 = vmatmul.msk.f32.gmra.mxu3 %vm290_vm0, %v266_v1 }
 0x20c   :  { %1628 = vmatmul.msk.f32.gmra.mxu3 %vm290_vm0, %v267_v2 }
 0x214   :  { %1629 = vmatmul.msk.f32.gmra.mxu3 %vm290_vm0, %v268_v3 }
 0x21c   :  { %1630 = vmatmul.msk.f32.gmra.mxu3 %vm290_vm0, %v269_v4 }
 0x224   :  { %1631 = vmatmul.msk.f32.gmra.mxu3 %vm290_vm0, %v270_v5  ;;  %v280_v5 = vld [vmem:[%s2580_s5 + $0xb0] sm:$0xff] }
 0x22c   :  { %1632 = vmatmul.msk.f32.gmra.mxu3 %vm290_vm0, %v271_v6 }
 0x234   :  { %1633 = vmatmul.msk.f32.gmra.mxu3 %vm290_vm0, %v272_v7 }
 0x23c   :  { %1634 = vmatmul.msk.f32.gmra.mxu3 %vm290_vm0, %v273_v8 }
 0x244   :  { %1635 = vmatmul.msk.f32.gmra.mxu3 %vm290_vm0, %v274_v11 }
 0x247   :  { %v404_v14 = vpop.f32.mrf.mxu3 }
 0x248   :  { %v1651_v15 = vmul.f32 -1.442695, %v404_v14 }
 0x24a   :  { %1756 = vpow2.f32 %v1651_v15 }
 0x24c   :  { %1636 = vmatmul.msk.f32.gmra.mxu3 %vm290_vm0, %v275_v16 }
 0x24f   :  { %v407_v17 = vpop.f32.mrf.mxu3 }
 0x250   :  { %v1757_v18 = vpop.eup %1756  ;;  %v1652_v19 = vmul.f32 -1.442695, %v407_v17 }
 0x251   :  { %v548_v20 = vadd.f32 1.0, %v1757_v18 }
 0x252   :  { %1758 = vpow2.f32 %v1652_v19 }
 0x253   :  { %1760 = vrcp.f32 %v548_v20  ;;  %v575_v30 = vand.u32 2147483648, %v548_v20  ;;  %v573_v32 = vand.u32 2147483647, %v548_v20  ;;  %vm569_vm2 = vweird.f32 %v548_v20 }
 0x254   :  { %1637 = vmatmul.msk.f32.gmra.mxu3 %vm290_vm0, %v276_v21 }
 0x255   :  { %v576_v40 = vor.u32 1.1754944e-38, %v575_v30  ;;  %vm574_vm5 = vcmp.eq.f32.partialorder %v573_v32, 8.507059e+37 }
 0x257   :  { %v410_v22 = vpop.f32.mrf.mxu3 }
 0x258   :  { %v1759_v23 = vpop.eup %1758  ;;  %v1653_v24 = vmul.f32 -1.442695, %v410_v22 }
 0x259   :  { %v1761_v25 = vpop.eup %1760  ;;  %v549_v26 = vadd.f32 1.0, %v1759_v23 }
 0x25a   :  { %1762 = vpow2.f32 %v1653_v24  ;;  %v565_v28 = vmul.f32 %v1761_v25, %v548_v20  ;;  %vm570_vm1 = vweird.f32 %v1761_v25  ;;  %v281_v20 = vld [vmem:[%s2580_s5 + $0xb8] sm:$0xff] }
 0x25b   :  { %1764 = vrcp.f32 %v549_v26  ;;  %vm571_vm3 = vmor %vm569_vm2, %vm570_vm1  ;;  %v590_v45 = vand.u32 2147483648, %v549_v26  ;;  %v588_v47 = vand.u32 2147483647, %v549_v26  ;;  %vm584_vm7 = vweird.f32 %v549_v26 }
 0x25c   :  { %1638 = vmatmul.msk.f32.gmra.mxu3 %vm290_vm0, %v277_v27  ;;  %v566_v29 = vsub.f32 1.0, %v565_v28 }
 0x25d   :  { %v591_v55 = vor.u32 1.1754944e-38, %v590_v45  ;;  %vm589_vm9 = vcmp.eq.f32.partialorder %v588_v47, 8.507059e+37 }
 0x25e   :  { %v567_v31 = vmul.f32 %v1761_v25, %v566_v29 }
 0x25f   :  { %v413_v33 = vpop.f32.mrf.mxu3 }
 0x260   :  { %v1763_v34 = vpop.eup %1762  ;;  %v1654_v35 = vmul.f32 -1.442695, %v413_v33  ;;  %v568_v36 = vadd.f32 %v1761_v25, %v567_v31 }
 0x261   :  { %v1765_v37 = vpop.eup %1764  ;;  %v550_v38 = vadd.f32 1.0, %v1763_v34 }
 0x262   :  { %1766 = vpow2.f32 %v1654_v35  ;;  %v572_v41 = vsel %vm571_vm3, %v1761_v25, %v568_v36  ;;  %v580_v42 = vmul.f32 %v1765_v37, %v549_v26  ;;  %vm585_vm6 = vweird.f32 %v1765_v37  ;;  %v282_v35 = vld [vmem:[%s2580_s5 + $0xc0] sm:$0xff] }
 0x263   :  { %1768 = vrcp.f32 %v550_v38  ;;  %v577_v43 = vsel %vm574_vm5, %v576_v40, %v572_v41  ;;  %vm586_vm8 = vmor %vm584_vm7, %vm585_vm6  ;;  %v605_v60 = vand.u32 2147483648, %v550_v38  ;;  %v603_v62 = vand.u32 2147483647, %v550_v38 }
 0x264   :  { %1639 = vmatmul.msk.f32.gmra.mxu3 %vm290_vm0, %v278_v39  ;;  %1683 = vmatmul.msk.f32.vlgmr.msrb.gmra.mxu2 %vm1112_vm4, %v577_v43  ;;  %v581_v44 = vsub.f32 1.0, %v580_v42  ;;  %vm599_vm11 = vweird.f32 %v550_v38 }
 0x265   :  { %1699 = vmatmul.msk.f32.vlgmr.msrb.gmra.mxu0 %vm1112_vm4, %v577_v43  ;;  %v606_v6 = vor.u32 1.1754944e-38, %v605_v60  ;;  %vm604_vm13 = vcmp.eq.f32.partialorder %v603_v62, 8.507059e+37 }
 0x266   :  { %v582_v46 = vmul.f32 %v1765_v37, %v581_v44 }
 0x267   :  { %v416_v48 = vpop.f32.mrf.mxu3 }
 0x268   :  { %v1767_v49 = vpop.eup %1766  ;;  %v1655_v50 = vmul.f32 -1.442695, %v416_v48  ;;  %v583_v51 = vadd.f32 %v1765_v37, %v582_v46 }
 0x269   :  { %v1769_v52 = vpop.eup %1768  ;;  %v551_v53 = vadd.f32 1.0, %v1767_v49 }
 0x26a   :  { %1770 = vpow2.f32 %v1655_v50  ;;  %v587_v56 = vsel %vm586_vm8, %v1765_v37, %v583_v51  ;;  %v595_v57 = vmul.f32 %v1769_v52, %v550_v38  ;;  %vm600_vm10 = vweird.f32 %v1769_v52  ;;  %v283_v50 = vld [vmem:[%s2580_s5 + $0xc8] sm:$0xff] }
 0x26b   :  { %1772 = vrcp.f32 %v551_v53  ;;  %v592_v58 = vsel %vm589_vm9, %v591_v55, %v587_v56  ;;  %vm601_vm12 = vmor %vm599_vm11, %vm600_vm10  ;;  %v620_v11 = vand.u32 2147483648, %v551_v53  ;;  %v618_v13 = vand.u32 2147483647, %v551_v53 }
 0x26c   :  { %1640 = vmatmul.msk.f32.gmra.mxu3 %vm290_vm0, %v279_v54  ;;  %1684 = vmatmul.msk.f32.gmra.mxu2 %vm1112_vm4, %v592_v58  ;;  %v596_v59 = vsub.f32 1.0, %v595_v57  ;;  %vm614_vm15 = vweird.f32 %v551_v53 }
 0x26d   :  { %1700 = vmatmul.msk.f32.gmra.mxu0 %vm1112_vm4, %v592_v58  ;;  %v621_v21 = vor.u32 1.1754944e-38, %v620_v11  ;;  %vm619_vm2 = vcmp.eq.f32.partialorder %v618_v13, 8.507059e+37 }
 0x26e   :  { %v597_v61 = vmul.f32 %v1769_v52, %v596_v59 }
 0x26f   :  { %v419_v63 = vpop.f32.mrf.mxu3 }
 0x270   :  { %v1771_v0 = vpop.eup %1770  ;;  %v1656_v1 = vmul.f32 -1.442695, %v419_v63  ;;  %v598_v2 = vadd.f32 %v1769_v52, %v597_v61 }
 0x271   :  { %v1773_v3 = vpop.eup %1772  ;;  %v552_v4 = vadd.f32 1.0, %v1771_v0 }
 0x272   :  { %1774 = vpow2.f32 %v1656_v1  ;;  %v602_v7 = vsel %vm601_vm12, %v1769_v52, %v598_v2  ;;  %v610_v8 = vmul.f32 %v1773_v3, %v551_v53  ;;  %vm615_vm14 = vweird.f32 %v1773_v3  ;;  %v284_v1 = vld [vmem:[%s2580_s5 + $0xd0] sm:$0xff] }
 0x273   :  { %1776 = vrcp.f32 %v552_v4  ;;  %v607_v9 = vsel %vm604_vm13, %v606_v6, %v602_v7  ;;  %vm616_vm1 = vmor %vm614_vm15, %vm615_vm14  ;;  %v635_v26 = vand.u32 2147483648, %v552_v4  ;;  %v633_v28 = vand.u32 2147483647, %v552_v4 }
 0x274   :  { %1641 = vmatmul.msk.f32.gmra.mxu3 %vm290_vm0, %v280_v5  ;;  %1685 = vmatmul.msk.f32.gmra.mxu2 %vm1112_vm4, %v607_v9  ;;  %v611_v10 = vsub.f32 1.0, %v610_v8  ;;  %vm629_vm5 = vweird.f32 %v552_v4 }
 0x275   :  { %1701 = vmatmul.msk.f32.gmra.mxu0 %vm1112_vm4, %v607_v9  ;;  %v636_v36 = vor.u32 1.1754944e-38, %v635_v26  ;;  %vm634_vm7 = vcmp.eq.f32.partialorder %v633_v28, 8.507059e+37 }
 0x276   :  { %v612_v12 = vmul.f32 %v1773_v3, %v611_v10 }
 0x277   :  { %v422_v14 = vpop.f32.mrf.mxu3 }
 0x278   :  { %v1775_v15 = vpop.eup %1774  ;;  %v1657_v16 = vmul.f32 -1.442695, %v422_v14  ;;  %v613_v17 = vadd.f32 %v1773_v3, %v612_v12 }
 0x279   :  { %v1777_v18 = vpop.eup %1776  ;;  %v553_v19 = vadd.f32 1.0, %v1775_v15 }
 0x27a   :  { %1778 = vpow2.f32 %v1657_v16  ;;  %v617_v22 = vsel %vm616_vm1, %v1773_v3, %v613_v17  ;;  %v625_v23 = vmul.f32 %v1777_v18, %v552_v4  ;;  %vm630_vm3 = vweird.f32 %v1777_v18  ;;  %v285_v16 = vld [vmem:[%s2580_s5 + $0xd8] sm:$0xff] }
 0x27b   :  { %1780 = vrcp.f32 %v553_v19  ;;  %v622_v24 = vsel %vm619_vm2, %v621_v21, %v617_v22  ;;  %vm631_vm6 = vmor %vm629_vm5, %vm630_vm3  ;;  %v650_v41 = vand.u32 2147483648, %v553_v19  ;;  %v648_v43 = vand.u32 2147483647, %v553_v19 }
 0x27c   :  { %1642 = vmatmul.msk.f32.gmra.mxu3 %vm290_vm0, %v281_v20  ;;  %1686 = vmatmul.msk.f32.gmra.mxu2 %vm1112_vm4, %v622_v24  ;;  %v626_v25 = vsub.f32 1.0, %v625_v23  ;;  %vm644_vm9 = vweird.f32 %v553_v19 }
 0x27d   :  { %1702 = vmatmul.msk.f32.gmra.mxu0 %vm1112_vm4, %v622_v24  ;;  %v651_v51 = vor.u32 1.1754944e-38, %v650_v41  ;;  %vm649_vm11 = vcmp.eq.f32.partialorder %v648_v43, 8.507059e+37 }
 0x27e   :  { %v627_v27 = vmul.f32 %v1777_v18, %v626_v25 }
 0x27f   :  { %v425_v29 = vpop.f32.mrf.mxu3 }
 0x280   :  { %v1779_v30 = vpop.eup %1778  ;;  %v1658_v31 = vmul.f32 -1.442695, %v425_v29  ;;  %v628_v32 = vadd.f32 %v1777_v18, %v627_v27 }
 0x281   :  { %v1781_v33 = vpop.eup %1780  ;;  %v554_v34 = vadd.f32 1.0, %v1779_v30 }
 0x282   :  { %1782 = vpow2.f32 %v1658_v31  ;;  %v632_v37 = vsel %vm631_vm6, %v1777_v18, %v628_v32  ;;  %v640_v38 = vmul.f32 %v1781_v33, %v553_v19  ;;  %vm645_vm8 = vweird.f32 %v1781_v33  ;;  %v286_v31 = vld [vmem:[%s2580_s5 + $0xe0] sm:$0xff] }
 0x283   :  { %1784 = vrcp.f32 %v554_v34  ;;  %v637_v39 = vsel %vm634_vm7, %v636_v36, %v632_v37  ;;  %vm646_vm10 = vmor %vm644_vm9, %vm645_vm8  ;;  %v665_v56 = vand.u32 2147483648, %v554_v34  ;;  %v663_v58 = vand.u32 2147483647, %v554_v34 }
 0x284   :  { %1643 = vmatmul.msk.f32.gmra.mxu3 %vm290_vm0, %v282_v35  ;;  %1687 = vmatmul.msk.f32.gmra.mxu2 %vm1112_vm4, %v637_v39  ;;  %v641_v40 = vsub.f32 1.0, %v640_v38  ;;  %vm659_vm13 = vweird.f32 %v554_v34 }
 0x285   :  { %1703 = vmatmul.msk.f32.gmra.mxu0 %vm1112_vm4, %v637_v39  ;;  %v666_v2 = vor.u32 1.1754944e-38, %v665_v56  ;;  %vm664_vm15 = vcmp.eq.f32.partialorder %v663_v58, 8.507059e+37 }
 0x286   :  { %v642_v42 = vmul.f32 %v1781_v33, %v641_v40 }
 0x287   :  { %v428_v44 = vpop.f32.mrf.mxu3 }
 0x288   :  { %v1783_v45 = vpop.eup %1782  ;;  %v1659_v46 = vmul.f32 -1.442695, %v428_v44  ;;  %v643_v47 = vadd.f32 %v1781_v33, %v642_v42 }
 0x289   :  { %v1785_v48 = vpop.eup %1784  ;;  %v555_v49 = vadd.f32 1.0, %v1783_v45 }
 0x28a   :  { %1786 = vpow2.f32 %v1659_v46  ;;  %v647_v52 = vsel %vm646_vm10, %v1781_v33, %v643_v47  ;;  %v655_v53 = vmul.f32 %v1785_v48, %v554_v34  ;;  %vm660_vm12 = vweird.f32 %v1785_v48  ;;  %v287_v46 = vld [vmem:[%s2580_s5 + $0xe8] sm:$0xff] }
 0x28b   :  { %1788 = vrcp.f32 %v555_v49  ;;  %v652_v54 = vsel %vm649_vm11, %v651_v51, %v647_v52  ;;  %vm661_vm14 = vmor %vm659_vm13, %vm660_vm12  ;;  %v680_v7 = vand.u32 2147483648, %v555_v49  ;;  %v678_v9 = vand.u32 2147483647, %v555_v49 }
 0x28c   :  { %1644 = vmatmul.msk.f32.gmra.mxu3 %vm290_vm0, %v283_v50  ;;  %1688 = vmatmul.msk.f32.gmra.mxu2 %vm1112_vm4, %v652_v54  ;;  %v656_v55 = vsub.f32 1.0, %v655_v53  ;;  %vm674_vm2 = vweird.f32 %v555_v49 }
 0x28d   :  { %1704 = vmatmul.msk.f32.gmra.mxu0 %vm1112_vm4, %v652_v54  ;;  %v681_v17 = vor.u32 1.1754944e-38, %v680_v7  ;;  %vm679_vm5 = vcmp.eq.f32.partialorder %v678_v9, 8.507059e+37 }
 0x28e   :  { %v657_v57 = vmul.f32 %v1785_v48, %v656_v55 }
 0x28f   :  { %v431_v59 = vpop.f32.mrf.mxu3 }
 0x290   :  { %v1787_v60 = vpop.eup %1786  ;;  %v1660_v61 = vmul.f32 -1.442695, %v431_v59  ;;  %v658_v62 = vadd.f32 %v1785_v48, %v657_v57 }
 0x291   :  { %v1789_v63 = vpop.eup %1788  ;;  %v556_v0 = vadd.f32 1.0, %v1787_v60 }
 0x292   :  { %1790 = vpow2.f32 %v1660_v61  ;;  %v662_v3 = vsel %vm661_vm14, %v1785_v48, %v658_v62  ;;  %v670_v4 = vmul.f32 %v1789_v63, %v555_v49  ;;  %vm675_vm1 = vweird.f32 %v1789_v63  ;;  %v288_v61 = vld [vmem:[%s2580_s5 + $0xf0] sm:$0xff] }
 0x293   :  { %1792 = vrcp.f32 %v556_v0  ;;  %v667_v5 = vsel %vm664_vm15, %v666_v2, %v662_v3  ;;  %vm676_vm3 = vmor %vm674_vm2, %vm675_vm1  ;;  %v695_v22 = vand.u32 2147483648, %v556_v0  ;;  %v693_v24 = vand.u32 2147483647, %v556_v0 }
 0x294   :  { %1645 = vmatmul.msk.f32.gmra.mxu3 %vm290_vm0, %v284_v1  ;;  %1689 = vmatmul.msk.f32.gmra.mxu2 %vm1112_vm4, %v667_v5  ;;  %v671_v6 = vsub.f32 1.0, %v670_v4  ;;  %vm689_vm7 = vweird.f32 %v556_v0 }
 0x295   :  { %1705 = vmatmul.msk.f32.gmra.mxu0 %vm1112_vm4, %v667_v5  ;;  %v696_v32 = vor.u32 1.1754944e-38, %v695_v22  ;;  %vm694_vm9 = vcmp.eq.f32.partialorder %v693_v24, 8.507059e+37 }
 0x296   :  { %v672_v8 = vmul.f32 %v1789_v63, %v671_v6 }
 0x297   :  { %v434_v10 = vpop.f32.mrf.mxu3 }
 0x298   :  { %v1791_v11 = vpop.eup %1790  ;;  %v1661_v12 = vmul.f32 -1.442695, %v434_v10  ;;  %v673_v13 = vadd.f32 %v1789_v63, %v672_v8 }
 0x299   :  { %v1793_v14 = vpop.eup %1792  ;;  %v557_v15 = vadd.f32 1.0, %v1791_v11 }
 0x29a   :  { %1794 = vpow2.f32 %v1661_v12  ;;  %v677_v18 = vsel %vm676_vm3, %v1789_v63, %v673_v13  ;;  %v685_v19 = vmul.f32 %v1793_v14, %v556_v0  ;;  %vm690_vm6 = vweird.f32 %v1793_v14  ;;  %v289_v12 = vld [vmem:[%s2580_s5 + $0xf8] sm:$0xff] }
 0x29b   :  { %1796 = vrcp.f32 %v557_v15  ;;  %v682_v20 = vsel %vm679_vm5, %v681_v17, %v677_v18  ;;  %vm691_vm8 = vmor %vm689_vm7, %vm690_vm6  ;;  %v710_v37 = vand.u32 2147483648, %v557_v15  ;;  %v708_v39 = vand.u32 2147483647, %v557_v15 }
 0x29c   :  { %1646 = vmatmul.msk.f32.gmra.mxu3 %vm290_vm0, %v285_v16  ;;  %1690 = vmatmul.msk.f32.gmra.mxu2 %vm1112_vm4, %v682_v20  ;;  %v686_v21 = vsub.f32 1.0, %v685_v19  ;;  %vm704_vm11 = vweird.f32 %v557_v15 }
 0x29d   :  { %1706 = vmatmul.msk.f32.gmra.mxu0 %vm1112_vm4, %v682_v20  ;;  %v711_v47 = vor.u32 1.1754944e-38, %v710_v37  ;;  %vm709_vm13 = vcmp.eq.f32.partialorder %v708_v39, 8.507059e+37 }
 0x29e   :  { %v687_v23 = vmul.f32 %v1793_v14, %v686_v21 }
 0x29f   :  { %v437_v25 = vpop.f32.mrf.mxu3 }
 0x2a0   :  { %v1795_v26 = vpop.eup %1794  ;;  %v1662_v27 = vmul.f32 -1.442695, %v437_v25  ;;  %v688_v28 = vadd.f32 %v1793_v14, %v687_v23 }
 0x2a1   :  { %v1797_v29 = vpop.eup %1796  ;;  %v558_v30 = vadd.f32 1.0, %v1795_v26 }
 0x2a2   :  { %1798 = vpow2.f32 %v1662_v27  ;;  %v692_v33 = vsel %vm691_vm8, %v1793_v14, %v688_v28  ;;  %v700_v34 = vmul.f32 %v1797_v29, %v557_v15  ;;  %vm705_vm10 = vweird.f32 %v1797_v29 }
 0x2a3   :  { %1800 = vrcp.f32 %v558_v30  ;;  %v697_v35 = vsel %vm694_vm9, %v696_v32, %v692_v33  ;;  %vm706_vm12 = vmor %vm704_vm11, %vm705_vm10  ;;  %v725_v52 = vand.u32 2147483648, %v558_v30  ;;  %v723_v54 = vand.u32 2147483647, %v558_v30 }
 0x2a4   :  { %1647 = vmatmul.msk.f32.gmra.mxu3 %vm290_vm0, %v286_v31  ;;  %1691 = vmatmul.msk.f32.gmra.mxu2 %vm1112_vm4, %v697_v35  ;;  %v701_v36 = vsub.f32 1.0, %v700_v34  ;;  %vm719_vm15 = vweird.f32 %v558_v30  ;;  %v1293_v31 = vld [vmem:[%s2582_s7 + $0x10] sm:$0xff] }
 0x2a5   :  { %1707 = vmatmul.msk.f32.gmra.mxu0 %vm1112_vm4, %v697_v35  ;;  %v726_v62 = vor.u32 1.1754944e-38, %v725_v52  ;;  %vm724_vm2 = vcmp.eq.f32.partialorder %v723_v54, 8.507059e+37  ;;  %1389 = vmatpush.msrb.mxu1 %v1293_v31 }
 0x2a6   :  { %v702_v38 = vmul.f32 %v1797_v29, %v701_v36 }
 0x2a7   :  { %v440_v40 = vpop.f32.mrf.mxu3 }
 0x2a8   :  { %v1799_v41 = vpop.eup %1798  ;;  %v1663_v42 = vmul.f32 -1.442695, %v440_v40  ;;  %v703_v43 = vadd.f32 %v1797_v29, %v702_v38 }
 0x2a9   :  { %v1801_v44 = vpop.eup %1800  ;;  %v559_v45 = vadd.f32 1.0, %v1799_v41 }
 0x2aa   :  { %1802 = vpow2.f32 %v1663_v42  ;;  %v707_v48 = vsel %vm706_vm12, %v1797_v29, %v703_v43  ;;  %v715_v49 = vmul.f32 %v1801_v44, %v558_v30  ;;  %vm720_vm14 = vweird.f32 %v1801_v44 }
 0x2ab   :  { %1804 = vrcp.f32 %v559_v45  ;;  %v712_v50 = vsel %vm709_vm13, %v711_v47, %v707_v48  ;;  %vm721_vm1 = vmor %vm719_vm15, %vm720_vm14  ;;  %v740_v3 = vand.u32 2147483648, %v559_v45  ;;  %v738_v5 = vand.u32 2147483647, %v559_v45 }
 0x2ac   :  { %1648 = vmatmul.msk.f32.gmra.mxu3 %vm290_vm0, %v287_v46  ;;  %1692 = vmatmul.msk.f32.gmra.mxu2 %vm1112_vm4, %v712_v50  ;;  %v716_v51 = vsub.f32 1.0, %v715_v49  ;;  %vm734_vm5 = vweird.f32 %v559_v45  ;;  %v1294_v46 = vld [vmem:[%s2582_s7 + $0x18] sm:$0xff] }
 0x2ad   :  { %1708 = vmatmul.msk.f32.gmra.mxu0 %vm1112_vm4, %v712_v50  ;;  %v741_v13 = vor.u32 1.1754944e-38, %v740_v3  ;;  %vm739_vm7 = vcmp.eq.f32.partialorder %v738_v5, 8.507059e+37  ;;  %1454 = vmatpush.msra.mxu2 %v1294_v46 }
 0x2ae   :  { %v717_v53 = vmul.f32 %v1801_v44, %v716_v51 }
 0x2af   :  { %v443_v55 = vpop.f32.mrf.mxu3 }
 0x2b0   :  { %v1803_v56 = vpop.eup %1802  ;;  %v1664_v57 = vmul.f32 -1.442695, %v443_v55  ;;  %v718_v58 = vadd.f32 %v1801_v44, %v717_v53 }
 0x2b1   :  { %v1805_v59 = vpop.eup %1804  ;;  %v560_v60 = vadd.f32 1.0, %v1803_v56 }
 0x2b2   :  { %1806 = vpow2.f32 %v1664_v57  ;;  %v722_v63 = vsel %vm721_vm1, %v1801_v44, %v718_v58  ;;  %v730_v0 = vmul.f32 %v1805_v59, %v559_v45  ;;  %vm735_vm3 = vweird.f32 %v1805_v59 }
 0x2b3   :  { %1808 = vrcp.f32 %v560_v60  ;;  %v727_v1 = vsel %vm724_vm2, %v726_v62, %v722_v63  ;;  %vm736_vm6 = vmor %vm734_vm5, %vm735_vm3  ;;  %v755_v18 = vand.u32 2147483648, %v560_v60  ;;  %v753_v20 = vand.u32 2147483647, %v560_v60 }
 0x2b4   :  { %1649 = vmatmul.msk.f32.gmra.mxu3 %vm290_vm0, %v288_v61  ;;  %1693 = vmatmul.msk.f32.gmra.mxu2 %vm1112_vm4, %v727_v1  ;;  %v731_v2 = vsub.f32 1.0, %v730_v0  ;;  %vm749_vm9 = vweird.f32 %v560_v60 }
 0x2b5   :  { %1709 = vmatmul.msk.f32.gmra.mxu0 %vm1112_vm4, %v727_v1  ;;  %v756_v27 = vor.u32 1.1754944e-38, %v755_v18 }
 0x2b6   :  { %v732_v4 = vmul.f32 %v1805_v59, %v731_v2 }
 0x2b7   :  { %v446_v6 = vpop.f32.mrf.mxu3 }
 0x2b8   :  { %v1807_v7 = vpop.eup %1806  ;;  %v1665_v8 = vmul.f32 -1.442695, %v446_v6  ;;  %v733_v9 = vadd.f32 %v1805_v59, %v732_v4 }
 0x2b9   :  { %v1809_v10 = vpop.eup %1808  ;;  %v561_v11 = vadd.f32 1.0, %v1807_v7 }
 0x2ba   :  { %1810 = vpow2.f32 %v1665_v8  ;;  %v737_v14 = vsel %vm736_vm6, %v1805_v59, %v733_v9  ;;  %v745_v15 = vmul.f32 %v1809_v10, %v560_v60  ;;  %vm750_vm8 = vweird.f32 %v1809_v10 }
 0x2bb   :  { %1812 = vrcp.f32 %v561_v11  ;;  %v742_v16 = vsel %vm739_vm7, %v741_v13, %v737_v14  ;;  %vm751_vm10 = vmor %vm749_vm9, %vm750_vm8  ;;  %v770_v33 = vand.u32 2147483648, %v561_v11  ;;  %v768_v35 = vand.u32 2147483647, %v561_v11 }
 0x2bc   :  { %1650 = vmatmul.msk.f32.gmra.mxu3 %vm290_vm0, %v289_v12  ;;  %1694 = vmatmul.msk.f32.gmra.mxu2 %vm1112_vm4, %v742_v16  ;;  %v746_v17 = vsub.f32 1.0, %v745_v15  ;;  %vm754_vm0 = vcmp.eq.f32.partialorder %v753_v20, 8.507059e+37  ;;  %vm764_vm12 = vweird.f32 %v561_v11 }
 0x2bd   :  { %1710 = vmatmul.msk.f32.gmra.mxu0 %vm1112_vm4, %v742_v16  ;;  %v771_v42 = vor.u32 1.1754944e-38, %v770_v33  ;;  %vm769_vm14 = vcmp.eq.f32.partialorder %v768_v35, 8.507059e+37 }
 0x2be   :  { %v747_v19 = vmul.f32 %v1809_v10, %v746_v17 }
 0x2bf   :  { %v449_v21 = vpop.f32.mrf.mxu3 }
 0x2c0   :  { %v1811_v22 = vpop.eup %1810  ;;  %v1666_v23 = vmul.f32 -1.442695, %v449_v21  ;;  %v748_v24 = vadd.f32 %v1809_v10, %v747_v19 }
 0x2c1   :  { %v1813_v25 = vpop.eup %1812  ;;  %v562_v26 = vadd.f32 1.0, %v1811_v22 }
 0x2c2   :  { %1814 = vpow2.f32 %v1666_v23  ;;  %v752_v28 = vsel %vm751_vm10, %v1809_v10, %v748_v24  ;;  %v760_v29 = vmul.f32 %v1813_v25, %v561_v11  ;;  %vm765_vm11 = vweird.f32 %v1813_v25 }
 0x2c3   :  { %1816 = vrcp.f32 %v562_v26  ;;  %v757_v30 = vsel %vm754_vm0, %v756_v27, %v752_v28  ;;  %vm766_vm13 = vmor %vm764_vm12, %vm765_vm11  ;;  %v785_v48 = vand.u32 2147483648, %v562_v26  ;;  %v783_v50 = vand.u32 2147483647, %v562_v26 }
 0x2c4   :  { %1695 = vmatmul.msk.f32.gmra.mxu2 %vm1112_vm4, %v757_v30  ;;  %v761_v32 = vsub.f32 1.0, %v760_v29  ;;  %vm779_vm1 = vweird.f32 %v562_v26 }
 0x2c5   :  { %1711 = vmatmul.msk.f32.gmra.mxu0 %vm1112_vm4, %v757_v30  ;;  %v786_v57 = vor.u32 1.1754944e-38, %v785_v48  ;;  %vm784_vm3 = vcmp.eq.f32.partialorder %v783_v50, 8.507059e+37 }
 0x2c6   :  { %v762_v34 = vmul.f32 %v1813_v25, %v761_v32 }
 0x2c7   :  { %v452_v36 = vpop.f32.mrf.mxu3 }
 0x2c8   :  { %v1815_v37 = vpop.eup %1814  ;;  %v1667_v38 = vmul.f32 -1.442695, %v452_v36  ;;  %v763_v39 = vadd.f32 %v1813_v25, %v762_v34 }
 0x2c9   :  { %v1817_v40 = vpop.eup %1816  ;;  %v563_v41 = vadd.f32 1.0, %v1815_v37 }
 0x2ca   :  { %1818 = vpow2.f32 %v1667_v38  ;;  %v767_v43 = vsel %vm766_vm13, %v1813_v25, %v763_v39  ;;  %v775_v44 = vmul.f32 %v1817_v40, %v562_v26  ;;  %vm780_vm15 = vweird.f32 %v1817_v40 }
 0x2cb   :  { %1820 = vrcp.f32 %v563_v41  ;;  %v772_v45 = vsel %vm769_vm14, %v771_v42, %v767_v43  ;;  %vm781_vm2 = vmor %vm779_vm1, %vm780_vm15  ;;  %v800_v62 = vand.u32 2147483648, %v563_v41  ;;  %v798_v0 = vand.u32 2147483647, %v563_v41 }
 0x2cc   :  { %1696 = vmatmul.msk.f32.gmra.mxu2 %vm1112_vm4, %v772_v45  ;;  %v776_v47 = vsub.f32 1.0, %v775_v44  ;;  %vm794_vm6 = vweird.f32 %v563_v41 }
 0x2cd   :  { %1712 = vmatmul.msk.f32.gmra.mxu0 %vm1112_vm4, %v772_v45  ;;  %v801_v7 = vor.u32 1.1754944e-38, %v800_v62  ;;  %vm799_vm8 = vcmp.eq.f32.partialorder %v798_v0, 8.507059e+37 }
 0x2ce   :  { %v777_v49 = vmul.f32 %v1817_v40, %v776_v47 }
 0x2cf   :  { %v455_v51 = vpop.f32.mrf.mxu3 }
 0x2d0   :  { %v1819_v52 = vpop.eup %1818  ;;  %v1668_v53 = vmul.f32 -1.442695, %v455_v51  ;;  %v778_v54 = vadd.f32 %v1817_v40, %v777_v49 }
 0x2d1   :  { %v1821_v55 = vpop.eup %1820  ;;  %v852_v56 = vadd.f32 1.0, %v1819_v52 }
 0x2d2   :  { %v790_v58 = vmul.f32 %v1821_v55, %v563_v41  ;;  %1822 = vpow2.f32 %v1668_v53  ;;  %v782_v59 = vsel %vm781_vm2, %v1817_v40, %v778_v54  ;;  %vm795_vm5 = vweird.f32 %v1821_v55 }
 0x2d3   :  { %1824 = vrcp.f32 %v852_v56  ;;  %v787_v60 = vsel %vm784_vm3, %v786_v57, %v782_v59  ;;  %vm796_vm7 = vmor %vm794_vm6, %vm795_vm5  ;;  %v879_v12 = vand.u32 2147483648, %v852_v56  ;;  %v877_v14 = vand.u32 2147483647, %v852_v56 }
 0x2d4   :  { %v791_v61 = vsub.f32 1.0, %v790_v58  ;;  %1697 = vmatmul.msk.f32.gmra.mxu2 %vm1112_vm4, %v787_v60  ;;  %vm873_vm10 = vweird.f32 %v852_v56 }
 0x2d5   :  { %1713 = vmatmul.msk.f32.gmra.mxu0 %vm1112_vm4, %v787_v60  ;;  %v880_v21 = vor.u32 1.1754944e-38, %v879_v12  ;;  %vm878_vm11 = vcmp.eq.f32.partialorder %v877_v14, 8.507059e+37 }
 0x2d6   :  { %v792_v63 = vmul.f32 %v1821_v55, %v791_v61 }
 0x2d7   :  { %v458_v1 = vpop.f32.mrf.mxu3 }
 0x2d8   :  { %v1823_v2 = vpop.eup %1822  ;;  %v1669_v3 = vmul.f32 -1.442695, %v458_v1  ;;  %v793_v4 = vadd.f32 %v1821_v55, %v792_v63 }
 0x2d9   :  { %v1825_v5 = vpop.eup %1824  ;;  %v853_v6 = vadd.f32 1.0, %v1823_v2 }
 0x2da   :  { %1826 = vpow2.f32 %v1669_v3  ;;  %v797_v8 = vsel %vm796_vm7, %v1821_v55, %v793_v4  ;;  %v869_v9 = vmul.f32 %v1825_v5, %v852_v56  ;;  %vm874_vm9 = vweird.f32 %v1825_v5 }
 0x2db   :  { %1828 = vrcp.f32 %v853_v6  ;;  %v802_v10 = vsel %vm799_vm8, %v801_v7, %v797_v8  ;;  %vm875_vm0 = vmor %vm873_vm10, %vm874_vm9  ;;  %v894_v26 = vand.u32 2147483648, %v853_v6  ;;  %v892_v28 = vand.u32 2147483647, %v853_v6 }
 0x2dc   :  { %1698 = vmatmul.msk.f32.vlgmr.msrb.gmra.mxu3 %vm1112_vm4, %v802_v10  ;;  %v870_v11 = vsub.f32 1.0, %v869_v9  ;;  %vm888_vm13 = vweird.f32 %v853_v6 }
 0x2dd   :  { %1714 = vmatmul.msk.f32.gmra.mxu0 %vm1112_vm4, %v802_v10  ;;  %v895_v35 = vor.u32 1.1754944e-38, %v894_v26  ;;  %vm893_vm15 = vcmp.eq.f32.partialorder %v892_v28, 8.507059e+37 }
 0x2de   :  { %v871_v13 = vmul.f32 %v1825_v5, %v870_v11 }
 0x2df   :  { %v461_v15 = vpop.f32.mrf.mxu3 }
 0x2e0   :  { %v1827_v16 = vpop.eup %1826  ;;  %v1670_v17 = vmul.f32 -1.442695, %v461_v15  ;;  %v872_v18 = vadd.f32 %v1825_v5, %v871_v13 }
 0x2e1   :  { %v1829_v19 = vpop.eup %1828  ;;  %v854_v20 = vadd.f32 1.0, %v1827_v16 }
 0x2e2   :  { %1830 = vpow2.f32 %v1670_v17  ;;  %v876_v22 = vsel %vm875_vm0, %v1825_v5, %v872_v18  ;;  %v884_v23 = vmul.f32 %v1829_v19, %v853_v6  ;;  %vm889_vm12 = vweird.f32 %v1829_v19  ;;  %v1292_v17 = vld [vmem:[%s2582_s7 + $0x8] sm:$0xff]  ;;  %v1291_v18 = vld [vmem:[%s2582_s7] sm:$0xff] }
 0x2e3   :  { %1832 = vrcp.f32 %v854_v20  ;;  %v881_v24 = vsel %vm878_vm11, %v880_v21, %v876_v22  ;;  %vm890_vm14 = vmor %vm888_vm13, %vm889_vm12  ;;  %v909_v40 = vand.u32 2147483648, %v854_v20  ;;  %v907_v42 = vand.u32 2147483647, %v854_v20  ;;  %1455 = vmatpush.msra.mxu2 %v1292_v17  ;;  %1390 = vmatpush.msrb.mxu1 %v1291_v18 }
 0x2e4   :  { %1311 = vrot.lane.b32.xlu0 %v881_v24, %s1943_s21  ;;  %v885_v25 = vsub.f32 1.0, %v884_v23  ;;  %vm903_vm2 = vweird.f32 %v854_v20 }
 0x2e5   :  { %v910_v49 = vor.u32 1.1754944e-38, %v909_v40  ;;  %vm908_vm5 = vcmp.eq.f32.partialorder %v907_v42, 8.507059e+37 }
 0x2e6   :  { %v886_v27 = vmul.f32 %v1829_v19, %v885_v25 }
 0x2e7   :  { %v464_v29 = vpop.f32.mrf.mxu3 }
 0x2e8   :  { %v1831_v30 = vpop.eup %1830  ;;  %v1671_v31 = vmul.f32 -1.442695, %v464_v29  ;;  %v887_v32 = vadd.f32 %v1829_v19, %v886_v27 }
 0x2e9   :  { %v1833_v33 = vpop.eup %1832  ;;  %v855_v34 = vadd.f32 1.0, %v1831_v30 }
 0x2ea   :  { %1834 = vpow2.f32 %v1671_v31  ;;  %v891_v36 = vsel %vm890_vm14, %v1829_v19, %v887_v32  ;;  %v899_v37 = vmul.f32 %v1833_v33, %v854_v20  ;;  %vm904_vm1 = vweird.f32 %v1833_v33 }
 0x2eb   :  { %1836 = vrcp.f32 %v855_v34  ;;  %v896_v38 = vsel %vm893_vm15, %v895_v35, %v891_v36  ;;  %vm905_vm3 = vmor %vm903_vm2, %vm904_vm1  ;;  %v924_v54 = vand.u32 2147483648, %v855_v34  ;;  %v922_v56 = vand.u32 2147483647, %v855_v34 }
 0x2ec   :  { %1313 = vrot.lane.b32.xlu1 %v896_v38, %s1943_s21  ;;  %v900_v39 = vsub.f32 1.0, %v899_v37  ;;  %vm918_vm7 = vweird.f32 %v855_v34 }
 0x2ed   :  { %v925_v63 = vor.u32 1.1754944e-38, %v924_v54  ;;  %vm923_vm9 = vcmp.eq.f32.partialorder %v922_v56, 8.507059e+37 }
 0x2ee   :  { %v901_v41 = vmul.f32 %v1833_v33, %v900_v39 }
 0x2ef   :  { %v467_v43 = vpop.f32.mrf.mxu3 }
 0x2f0   :  { %v1835_v44 = vpop.eup %1834  ;;  %v1672_v45 = vmul.f32 -1.442695, %v467_v43  ;;  %v902_v46 = vadd.f32 %v1833_v33, %v901_v41 }
 0x2f1   :  { %v1837_v47 = vpop.eup %1836  ;;  %v856_v48 = vadd.f32 1.0, %v1835_v44 }
 0x2f2   :  { %1838 = vpow2.f32 %v1672_v45  ;;  %v906_v50 = vsel %vm905_vm3, %v1833_v33, %v902_v46  ;;  %v914_v51 = vmul.f32 %v1837_v47, %v855_v34  ;;  %vm919_vm6 = vweird.f32 %v1837_v47 }
 0x2f3   :  { %1840 = vrcp.f32 %v856_v48  ;;  %v911_v52 = vsel %vm908_vm5, %v910_v49, %v906_v50  ;;  %vm920_vm8 = vmor %vm918_vm7, %vm919_vm6  ;;  %v939_v4 = vand.u32 2147483648, %v856_v48  ;;  %v937_v6 = vand.u32 2147483647, %v856_v48 }
 0x2f4   :  { %1315 = vrot.lane.b32.xlu1 %v911_v52, %s1943_s21  ;;  %v915_v53 = vsub.f32 1.0, %v914_v51  ;;  %vm933_vm0 = vweird.f32 %v856_v48 }
 0x2f5   :  { %v940_v13 = vor.u32 1.1754944e-38, %v939_v4  ;;  %vm938_vm12 = vcmp.eq.f32.partialorder %v937_v6, 8.507059e+37 }
 0x2f6   :  { %v916_v55 = vmul.f32 %v1837_v47, %v915_v53 }
 0x2f7   :  { %v470_v57 = vpop.f32.mrf.mxu3 }
 0x2f8   :  { %v1839_v58 = vpop.eup %1838  ;;  %v1673_v59 = vmul.f32 -1.442695, %v470_v57  ;;  %v917_v60 = vadd.f32 %v1837_v47, %v916_v55 }
 0x2f9   :  { %v1841_v61 = vpop.eup %1840  ;;  %v857_v62 = vadd.f32 1.0, %v1839_v58 }
 0x2fa   :  { %1842 = vpow2.f32 %v1673_v59  ;;  %v921_v0 = vsel %vm920_vm8, %v1837_v47, %v917_v60  ;;  %v929_v1 = vmul.f32 %v1841_v61, %v856_v48  ;;  %vm934_vm10 = vweird.f32 %v1841_v61 }
 0x2fb   :  { %1844 = vrcp.f32 %v857_v62  ;;  %v926_v2 = vsel %vm923_vm9, %v925_v63, %v921_v0  ;;  %vm935_vm11 = vmor %vm933_vm0, %vm934_vm10  ;;  %v954_v20 = vand.u32 2147483648, %v857_v62  ;;  %v952_v22 = vand.u32 2147483647, %v857_v62 }
 0x2fc   :  { %1317 = vrot.lane.b32.xlu2 %v926_v2, %s1943_s21  ;;  %v930_v3 = vsub.f32 1.0, %v929_v1  ;;  %vm948_vm14 = vweird.f32 %v857_v62 }
 0x2fd   :  { %v955_v29 = vor.u32 1.1754944e-38, %v954_v20  ;;  %vm953_vm1 = vcmp.eq.f32.partialorder %v952_v22, 8.507059e+37 }
 0x2fe   :  { %v931_v5 = vmul.f32 %v1841_v61, %v930_v3 }
 0x2ff   :  { %v473_v7 = vpop.f32.mrf.mxu3 }
 0x300   :  { %v1843_v8 = vpop.eup %1842  ;;  %v1674_v9 = vmul.f32 -1.442695, %v473_v7  ;;  %v932_v10 = vadd.f32 %v1841_v61, %v931_v5 }
 0x301   :  { %v1845_v11 = vpop.eup %1844  ;;  %v858_v12 = vadd.f32 1.0, %v1843_v8 }
 0x302   :  { %1846 = vpow2.f32 %v1674_v9  ;;  %v936_v14 = vsel %vm935_vm11, %v1841_v61, %v932_v10  ;;  %v944_v15 = vmul.f32 %v1845_v11, %v857_v62  ;;  %vm949_vm13 = vweird.f32 %v1845_v11 }
 0x303   :  { %1848 = vrcp.f32 %v858_v12  ;;  %v941_v16 = vsel %vm938_vm12, %v940_v13, %v936_v14  ;;  %vm950_vm15 = vmor %vm948_vm14, %vm949_vm13  ;;  %v969_v34 = vand.u32 2147483648, %v858_v12  ;;  %v967_v36 = vand.u32 2147483647, %v858_v12 }
 0x304   :  { %1319 = vrot.lane.b32.xlu2 %v941_v16, %s1943_s21  ;;  %v945_v19 = vsub.f32 1.0, %v944_v15  ;;  %vm963_vm3 = vweird.f32 %v858_v12 }
 0x305   :  { %v970_v43 = vor.u32 1.1754944e-38, %v969_v34  ;;  %vm968_vm6 = vcmp.eq.f32.partialorder %v967_v36, 8.507059e+37 }
 0x306   :  { %v946_v21 = vmul.f32 %v1845_v11, %v945_v19 }
 0x307   :  { %v476_v23 = vpop.f32.mrf.mxu3 }
 0x308   :  { %v1847_v24 = vpop.eup %1846  ;;  %v1675_v25 = vmul.f32 -1.442695, %v476_v23  ;;  %v947_v26 = vadd.f32 %v1845_v11, %v946_v21 }
 0x309   :  { %v1849_v27 = vpop.eup %1848  ;;  %v859_v28 = vadd.f32 1.0, %v1847_v24 }
 0x30a   :  { %1850 = vpow2.f32 %v1675_v25  ;;  %v951_v30 = vsel %vm950_vm15, %v1845_v11, %v947_v26  ;;  %v959_v31 = vmul.f32 %v1849_v27, %v858_v12  ;;  %vm964_vm2 = vweird.f32 %v1849_v27 }
 0x30b   :  { %1852 = vrcp.f32 %v859_v28  ;;  %v956_v32 = vsel %vm953_vm1, %v955_v29, %v951_v30  ;;  %vm965_vm5 = vmor %vm963_vm3, %vm964_vm2  ;;  %v984_v48 = vand.u32 2147483648, %v859_v28  ;;  %v982_v50 = vand.u32 2147483647, %v859_v28 }
 0x30c   :  { %1321 = vrot.lane.b32.xlu0 %v956_v32, %s1943_s21  ;;  %v960_v33 = vsub.f32 1.0, %v959_v31  ;;  %vm978_vm8 = vweird.f32 %v859_v28 }
 0x30d   :  { %v985_v57 = vor.u32 1.1754944e-38, %v984_v48  ;;  %vm983_vm10 = vcmp.eq.f32.partialorder %v982_v50, 8.507059e+37 }
 0x30e   :  { %v961_v35 = vmul.f32 %v1849_v27, %v960_v33 }
 0x30f   :  { %v479_v37 = vpop.f32.mrf.mxu3 }
 0x310   :  { %v1851_v38 = vpop.eup %1850  ;;  %v1676_v39 = vmul.f32 -1.442695, %v479_v37  ;;  %v962_v40 = vadd.f32 %v1849_v27, %v961_v35 }
 0x311   :  { %v1853_v41 = vpop.eup %1852  ;;  %v860_v42 = vadd.f32 1.0, %v1851_v38 }
 0x312   :  { %1854 = vpow2.f32 %v1676_v39  ;;  %v966_v44 = vsel %vm965_vm5, %v1849_v27, %v962_v40  ;;  %v974_v45 = vmul.f32 %v1853_v41, %v859_v28  ;;  %vm979_vm7 = vweird.f32 %v1853_v41 }
 0x313   :  { %1856 = vrcp.f32 %v860_v42  ;;  %v971_v46 = vsel %vm968_vm6, %v970_v43, %v966_v44  ;;  %vm980_vm9 = vmor %vm978_vm8, %vm979_vm7  ;;  %v999_v62 = vand.u32 2147483648, %v860_v42  ;;  %v997_v0 = vand.u32 2147483647, %v860_v42 }
 0x314   :  { %1323 = vrot.lane.b32.xlu1 %v971_v46, %s1943_s21  ;;  %v975_v47 = vsub.f32 1.0, %v974_v45  ;;  %vm993_vm11 = vweird.f32 %v860_v42 }
 0x315   :  { %v1000_v7 = vor.u32 1.1754944e-38, %v999_v62  ;;  %vm998_vm13 = vcmp.eq.f32.partialorder %v997_v0, 8.507059e+37 }
 0x316   :  { %v976_v49 = vmul.f32 %v1853_v41, %v975_v47 }
 0x317   :  { %v482_v51 = vpop.f32.mrf.mxu3 }
 0x318   :  { %v1855_v52 = vpop.eup %1854  ;;  %v1677_v53 = vmul.f32 -1.442695, %v482_v51  ;;  %v977_v54 = vadd.f32 %v1853_v41, %v976_v49 }
 0x319   :  { %v1857_v55 = vpop.eup %1856  ;;  %v861_v56 = vadd.f32 1.0, %v1855_v52 }
 0x31a   :  { %1858 = vpow2.f32 %v1677_v53  ;;  %v981_v58 = vsel %vm980_vm9, %v1853_v41, %v977_v54  ;;  %v989_v59 = vmul.f32 %v1857_v55, %v860_v42  ;;  %vm994_vm0 = vweird.f32 %v1857_v55 }
 0x31b   :  { %1860 = vrcp.f32 %v861_v56  ;;  %v986_v60 = vsel %vm983_vm10, %v985_v57, %v981_v58  ;;  %vm995_vm12 = vmor %vm993_vm11, %vm994_vm0  ;;  %v1014_v12 = vand.u32 2147483648, %v861_v56  ;;  %v1012_v14 = vand.u32 2147483647, %v861_v56 }
 0x31c   :  { %1325 = vrot.lane.b32.xlu2 %v986_v60, %s1943_s21  ;;  %v990_v61 = vsub.f32 1.0, %v989_v59  ;;  %vm1008_vm15 = vweird.f32 %v861_v56 }
 0x31d   :  { %v1015_v21 = vor.u32 1.1754944e-38, %v1014_v12  ;;  %vm1013_vm2 = vcmp.eq.f32.partialorder %v1012_v14, 8.507059e+37 }
 0x31e   :  { %v991_v63 = vmul.f32 %v1857_v55, %v990_v61 }
 0x31f   :  { %v485_v1 = vpop.f32.mrf.mxu3 }
 0x320   :  { %v1859_v2 = vpop.eup %1858  ;;  %v1678_v3 = vmul.f32 -1.442695, %v485_v1  ;;  %v992_v4 = vadd.f32 %v1857_v55, %v991_v63 }
 0x321   :  { %v1861_v5 = vpop.eup %1860  ;;  %v862_v6 = vadd.f32 1.0, %v1859_v2 }
 0x322   :  { %1862 = vpow2.f32 %v1678_v3  ;;  %v996_v8 = vsel %vm995_vm12, %v1857_v55, %v992_v4  ;;  %v1004_v9 = vmul.f32 %v1861_v5, %v861_v56  ;;  %vm1009_vm14 = vweird.f32 %v1861_v5 }
 0x323   :  { %1864 = vrcp.f32 %v862_v6  ;;  %v1001_v10 = vsel %vm998_vm13, %v1000_v7, %v996_v8  ;;  %vm1010_vm1 = vmor %vm1008_vm15, %vm1009_vm14  ;;  %v1029_v26 = vand.u32 2147483648, %v862_v6  ;;  %v1027_v28 = vand.u32 2147483647, %v862_v6 }
 0x324   :  { %1327 = vrot.lane.b32.xlu0 %v1001_v10, %s1943_s21  ;;  %v1005_v11 = vsub.f32 1.0, %v1004_v9  ;;  %vm1023_vm5 = vweird.f32 %v862_v6 }
 0x325   :  { %v1030_v35 = vor.u32 1.1754944e-38, %v1029_v26  ;;  %vm1028_vm7 = vcmp.eq.f32.partialorder %v1027_v28, 8.507059e+37 }
 0x326   :  { %v1006_v13 = vmul.f32 %v1861_v5, %v1005_v11 }
 0x327   :  { %v488_v15 = vpop.f32.mrf.mxu3 }
 0x328   :  { %v1863_v16 = vpop.eup %1862  ;;  %v1679_v17 = vmul.f32 -1.442695, %v488_v15  ;;  %v1007_v18 = vadd.f32 %v1861_v5, %v1006_v13 }
 0x329   :  { %v1865_v19 = vpop.eup %1864  ;;  %v863_v20 = vadd.f32 1.0, %v1863_v16 }
 0x32a   :  { %1866 = vpow2.f32 %v1679_v17  ;;  %v1011_v22 = vsel %vm1010_vm1, %v1861_v5, %v1007_v18  ;;  %v1019_v23 = vmul.f32 %v1865_v19, %v862_v6  ;;  %vm1024_vm3 = vweird.f32 %v1865_v19  ;;  %v2396_v5 = vpop.f32.mrf.mxu2 }
 0x32b   :  { %1868 = vrcp.f32 %v863_v20  ;;  %v1016_v24 = vsel %vm1013_vm2, %v1015_v21, %v1011_v22  ;;  %vm1025_vm6 = vmor %vm1023_vm5, %vm1024_vm3  ;;  %v1044_v40 = vand.u32 2147483648, %v863_v20  ;;  %v1042_v42 = vand.u32 2147483647, %v863_v20 }
 0x32c   :  { %1329 = vrot.lane.b32.xlu1 %v1016_v24, %s1943_s21  ;;  %v1020_v25 = vsub.f32 1.0, %v1019_v23  ;;  %vm1038_vm9 = vweird.f32 %v863_v20 }
 0x32d   :  { %v1045_v49 = vor.u32 1.1754944e-38, %v1044_v40  ;;  %vm1043_vm0 = vcmp.eq.f32.partialorder %v1042_v42, 8.507059e+37 }
 0x32e   :  { %v1021_v27 = vmul.f32 %v1865_v19, %v1020_v25 }
 0x32f   :  { %v491_v29 = vpop.f32.mrf.mxu3 }
 0x330   :  { %v1867_v30 = vpop.eup %1866  ;;  %v1680_v31 = vmul.f32 -1.442695, %v491_v29  ;;  %v1022_v32 = vadd.f32 %v1865_v19, %v1021_v27 }
 0x331   :  { %v1869_v33 = vpop.eup %1868  ;;  %v864_v34 = vadd.f32 1.0, %v1867_v30 }
 0x332   :  { %1870 = vpow2.f32 %v1680_v31  ;;  %v1026_v36 = vsel %vm1025_vm6, %v1865_v19, %v1022_v32  ;;  %v1034_v37 = vmul.f32 %v1869_v33, %v863_v20  ;;  %vm1039_vm8 = vweird.f32 %v1869_v33  ;;  %v2399_v20 = vpop.f32.mrf.mxu2 }
 0x333   :  { %1872 = vrcp.f32 %v864_v34  ;;  %v1031_v38 = vsel %vm1028_vm7, %v1030_v35, %v1026_v36  ;;  %vm1040_vm10 = vmor %vm1038_vm9, %vm1039_vm8  ;;  %v1059_v54 = vand.u32 2147483648, %v864_v34  ;;  %v1057_v56 = vand.u32 2147483647, %v864_v34 }
 0x334   :  { %1331 = vrot.lane.b32.xlu2 %v1031_v38, %s1943_s21  ;;  %v1035_v39 = vsub.f32 1.0, %v1034_v37  ;;  %vm1053_vm12 = vweird.f32 %v864_v34 }
 0x335   :  { %v1060_v63 = vor.u32 1.1754944e-38, %v1059_v54  ;;  %vm1058_vm14 = vcmp.eq.f32.partialorder %v1057_v56, 8.507059e+37 }
 0x336   :  { %v1036_v41 = vmul.f32 %v1869_v33, %v1035_v39 }
 0x337   :  { %v494_v43 = vpop.f32.mrf.mxu3 }
 0x338   :  { %v1871_v44 = vpop.eup %1870  ;;  %v1681_v45 = vmul.f32 -1.442695, %v494_v43  ;;  %v1037_v46 = vadd.f32 %v1869_v33, %v1036_v41 }
 0x339   :  { %v1873_v47 = vpop.eup %1872  ;;  %v865_v48 = vadd.f32 1.0, %v1871_v44 }
 0x33a   :  { %1874 = vpow2.f32 %v1681_v45  ;;  %v1041_v50 = vsel %vm1040_vm10, %v1869_v33, %v1037_v46  ;;  %v1049_v51 = vmul.f32 %v1873_v47, %v864_v34  ;;  %vm1054_vm11 = vweird.f32 %v1873_v47  ;;  %v2404_v34 = vpop.f32.mrf.mxu2 }
 0x33b   :  { %1876 = vrcp.f32 %v865_v48  ;;  %v1046_v52 = vsel %vm1043_vm0, %v1045_v49, %v1041_v50  ;;  %vm1055_vm13 = vmor %vm1053_vm12, %vm1054_vm11  ;;  %v1074_v4 = vand.u32 2147483648, %v865_v48  ;;  %v1072_v7 = vand.u32 2147483647, %v865_v48 }
 0x33c   :  { %1333 = vrot.lane.b32.xlu0 %v1046_v52, %s1943_s21  ;;  %v1050_v53 = vsub.f32 1.0, %v1049_v51  ;;  %vm1068_vm1 = vweird.f32 %v865_v48 }
 0x33d   :  { %v1075_v12 = vor.u32 1.1754944e-38, %v1074_v4  ;;  %vm1073_vm3 = vcmp.eq.f32.partialorder %v1072_v7, 8.507059e+37 }
 0x33e   :  { %v1051_v55 = vmul.f32 %v1873_v47, %v1050_v53 }
 0x33f   :  { %v497_v57 = vpop.f32.mrf.mxu3 }
 0x340   :  { %v1875_v58 = vpop.eup %1874  ;;  %v1682_v59 = vmul.f32 -1.442695, %v497_v57  ;;  %v1052_v60 = vadd.f32 %v1873_v47, %v1051_v55 }
 0x341   :  { %v1877_v61 = vpop.eup %1876  ;;  %v866_v62 = vadd.f32 1.0, %v1875_v58  ;;  %v1243_v58 = vpop.f32.mrf.mxu0 }
 0x342   :  { %1878 = vpow2.f32 %v1682_v59  ;;  %v1056_v0 = vsel %vm1055_vm13, %v1873_v47, %v1052_v60  ;;  %v1064_v1 = vmul.f32 %v1877_v61, %v865_v48  ;;  %vm1069_vm15 = vweird.f32 %v1877_v61  ;;  %v2409_v38 = vpop.f32.mrf.mxu2 }
 0x343   :  { %1880 = vrcp.f32 %v866_v62  ;;  %v1061_v2 = vsel %vm1058_vm14, %v1060_v63, %v1056_v0  ;;  %vm1070_vm2 = vmor %vm1068_vm1, %vm1069_vm15  ;;  %v1089_v17 = vand.u32 2147483648, %v866_v62  ;;  %v1087_v19 = vand.u32 2147483647, %v866_v62 }
 0x344   :  { %1335 = vrot.lane.b32.xlu1 %v1061_v2, %s1943_s21  ;;  %v1065_v3 = vsub.f32 1.0, %v1064_v1  ;;  %vm1083_vm6 = vweird.f32 %v866_v62 }
 0x345   :  { %v1090_v23 = vor.u32 1.1754944e-38, %v1089_v17  ;;  %vm1088_vm8 = vcmp.eq.f32.partialorder %v1087_v19, 8.507059e+37  ;;  %v1887_v17 = vld [vmem:[%s2575_s0 + $0x18] sm:$0xff] }
 0x346   :  { %v1066_v6 = vmul.f32 %v1877_v61, %v1065_v3  ;;  %v1884_v3 = vld [vmem:[%s2575_s0] sm:$0xff] }
 0x347   :  { %v1505_v4 = vmul.f32 %v1884_v3, %v2396_v5 }
 0x348   :  { %v1879_v8 = vpop.eup %1878  ;;  %v1067_v9 = vadd.f32 %v1877_v61, %v1066_v6 }
 0x349   :  { %v1881_v10 = vpop.eup %1880  ;;  %v867_v11 = vadd.f32 1.0, %v1879_v8 }
 0x34a   :  { %v1071_v13 = vsel %vm1070_vm2, %v1877_v61, %v1067_v9  ;;  %v1079_v14 = vmul.f32 %v1881_v10, %v866_v62  ;;  %vm1084_vm5 = vweird.f32 %v1881_v10  ;;  %v2413_v41 = vpop.f32.mrf.mxu2  ;;  %v1246_v61 = vpop.f32.mrf.mxu0  ;;  %v1885_v9 = vld [vmem:[%s2575_s0 + $0x8] sm:$0xff] }
 0x34b   :  { %1882 = vrcp.f32 %v867_v11  ;;  %v1076_v15 = vsel %vm1073_vm3, %v1075_v12, %v1071_v13  ;;  %vm1085_vm7 = vmor %vm1083_vm6, %vm1084_vm5  ;;  %v1104_v28 = vand.u32 2147483648, %v867_v11  ;;  %v1102_v31 = vand.u32 2147483647, %v867_v11  ;;  %v1886_v12 = vld [vmem:[%s2575_s0 + $0x10] sm:$0xff] }
 0x34c   :  { %1337 = vrot.lane.b32.xlu2 %v1076_v15, %s1943_s21  ;;  %v1080_v16 = vsub.f32 1.0, %v1079_v14  ;;  %vm1098_vm10 = vweird.f32 %v867_v11  ;;  %v1507_v13 = vmul.f32 %v1886_v12, %v2399_v20 }
 0x34d   :  { %v1105_v33 = vor.u32 1.1754944e-38, %v1104_v28  ;;  %vm1103_vm11 = vcmp.eq.f32.partialorder %v1102_v31, 8.507059e+37 }
 0x34e   :  { %v1081_v18 = vmul.f32 %v1881_v10, %v1080_v16 }
 0x350   :  { %v1082_v21 = vadd.f32 %v1881_v10, %v1081_v18  ;;  %v1508_v18 = vmul.f32 %v1887_v17, %v1246_v61  ;;  %v1900_v17 = vld [vmem:[%s2575_s0 + $0x80] sm:$0xff] }
 0x351   :  { %v1883_v22 = vpop.eup %1882 }
 0x352   :  { %v1086_v24 = vsel %vm1085_vm7, %v1881_v10, %v1082_v21  ;;  %v1094_v25 = vmul.f32 %v1883_v22, %v867_v11  ;;  %vm1099_vm9 = vweird.f32 %v1883_v22  ;;  %v2419_v43 = vpop.f32.mrf.mxu2  ;;  %v1249_v0 = vpop.f32.mrf.mxu0  ;;  %v1506_v10 = vmul.f32 %v1885_v9, %v1243_v58  ;;  %v1888_v21 = vld [vmem:[%s2575_s0 + $0x20] sm:$0xff] }
 0x353   :  { %v1091_v26 = vsel %vm1088_vm8, %v1090_v23, %v1086_v24  ;;  %vm1100_vm0 = vmor %vm1098_vm10, %vm1099_vm9 }
 0x354   :  { %1339 = vrot.lane.b32.xlu0 %v1091_v26, %s1943_s21  ;;  %v1095_v27 = vsub.f32 1.0, %v1094_v25  ;;  %v1889_v25 = vld [vmem:[%s2575_s0 + $0x28] sm:$0xff] }
 0x355   :  { %v1510_v26 = vmul.f32 %v1889_v25, %v1249_v0  ;;  %v1896_v0 = vld [vmem:[%s2575_s0 + $0x60] sm:$0xff] }
 0x356   :  { %v1312_v29 = vpop.permute.xlu0 %1311  ;;  %v1096_v30 = vmul.f32 %v1883_v22, %v1095_v27  ;;  %v1318_v40 = vpop.permute.xlu2 %1317 }
 0x357   :  { %1715 = vmatmul.msk.f32.vlgmr.msrb.gmra.mxu1 %vm1112_vm4, %v1312_v29  ;;  %1731 = vmatmul.msk.f32.vlgmr.msra.gmra.mxu2 %vm1112_vm4, %v1312_v29  ;;  %v1890_v29 = vld [vmem:[%s2575_s0 + $0x30] sm:$0xff] }
 0x358   :  { %v1097_v32 = vadd.f32 %v1883_v22, %v1096_v30  ;;  %v1511_v30 = vmul.f32 %v1890_v29, %v2409_v38  ;;  %v1903_v29 = vld [vmem:[%s2575_s0 + $0x98] sm:$0xff] }
 0x35a   :  { %v1101_v35 = vsel %vm1100_vm0, %v1883_v22, %v1097_v32  ;;  %v2423_v45 = vpop.f32.mrf.mxu2  ;;  %v1252_v8 = vpop.f32.mrf.mxu0  ;;  %v1509_v22 = vmul.f32 %v1888_v21, %v2404_v34  ;;  %v1891_v34 = vld [vmem:[%s2575_s0 + $0x38] sm:$0xff] }
 0x35b   :  { %v1106_v36 = vsel %vm1103_vm11, %v1105_v33, %v1101_v35  ;;  %v1512_v35 = vmul.f32 %v1891_v34, %v1252_v8 }
 0x35c   :  { %1341 = vrot.lane.b32.xlu1 %v1106_v36, %s1943_s21 }
 0x35e   :  { %v1314_v37 = vpop.permute.xlu1 %1313  ;;  %v1320_v42 = vpop.permute.xlu2 %1319 }
 0x35f   :  { %1716 = vmatmul.msk.f32.gmra.mxu1 %vm1112_vm4, %v1314_v37  ;;  %1732 = vmatmul.msk.f32.gmra.mxu2 %vm1112_vm4, %v1314_v37  ;;  %v1892_v37 = vld [vmem:[%s2575_s0 + $0x40] sm:$0xff] }
 0x362   :  { %v2427_v47 = vpop.f32.mrf.mxu2  ;;  %v1255_v16 = vpop.f32.mrf.mxu0 }
 0x366   :  { %v1316_v39 = vpop.permute.xlu1 %1315 }
 0x367   :  { %1717 = vmatmul.msk.f32.gmra.mxu1 %vm1112_vm4, %v1316_v39  ;;  %1733 = vmatmul.msk.f32.gmra.mxu2 %vm1112_vm4, %v1316_v39  ;;  %v1513_v39 = vmul.f32 %v1892_v37, %v2413_v41  ;;  %v1905_v37 = vld [vmem:[%s2575_s0 + $0xa8] sm:$0xff] }
 0x36a   :  { %v2431_v49 = vpop.f32.mrf.mxu2  ;;  %v1258_v27 = vpop.f32.mrf.mxu0 }
 0x36f   :  { %1718 = vmatmul.msk.f32.gmra.mxu1 %vm1112_vm4, %v1318_v40  ;;  %1734 = vmatmul.msk.f32.gmra.mxu2 %vm1112_vm4, %v1318_v40 }
 0x372   :  { %v2437_v52 = vpop.f32.mrf.mxu2 }
 0x376   :  { %v1326_v48 = vpop.permute.xlu2 %1325 }
 0x377   :  { %1719 = vmatmul.msk.f32.gmra.mxu1 %vm1112_vm4, %v1320_v42  ;;  %1735 = vmatmul.msk.f32.gmra.mxu2 %vm1112_vm4, %v1320_v42  ;;  %v1261_v42 = vpop.f32.mrf.mxu0 }
 0x37a   :  { %v2441_v54 = vpop.f32.mrf.mxu2 }
 0x37e   :  { %v1322_v44 = vpop.permute.xlu0 %1321 }
 0x37f   :  { %1720 = vmatmul.msk.f32.gmra.mxu1 %vm1112_vm4, %v1322_v44  ;;  %1736 = vmatmul.msk.f32.gmra.mxu2 %vm1112_vm4, %v1322_v44  ;;  %v1264_v58 = vpop.f32.mrf.mxu0 }
 0x382   :  { %v2445_v56 = vpop.f32.mrf.mxu2 }
 0x386   :  { %v1324_v46 = vpop.permute.xlu1 %1323 }
 0x387   :  { %1721 = vmatmul.msk.f32.gmra.mxu1 %vm1112_vm4, %v1324_v46  ;;  %1737 = vmatmul.msk.f32.gmra.mxu2 %vm1112_vm4, %v1324_v46  ;;  %v1893_v46 = vld [vmem:[%s2575_s0 + $0x48] sm:$0xff] }
 0x38a   :  { %v2449_v59 = vpop.f32.mrf.mxu2 }
 0x38e   :  { %v1332_v53 = vpop.permute.xlu2 %1331 }
 0x38f   :  { %1722 = vmatmul.msk.f32.gmra.mxu1 %vm1112_vm4, %v1326_v48  ;;  %1738 = vmatmul.msk.f32.gmra.mxu2 %vm1112_vm4, %v1326_v48  ;;  %v1514_v48 = vmul.f32 %v1893_v46, %v1255_v16 }
 0x392   :  { %v2455_v63 = vpop.f32.mrf.mxu2 }
 0x396   :  { %v1328_v50 = vpop.permute.xlu0 %1327 }
 0x397   :  { %1723 = vmatmul.msk.f32.gmra.mxu1 %vm1112_vm4, %v1328_v50  ;;  %1739 = vmatmul.msk.f32.gmra.mxu2 %vm1112_vm4, %v1328_v50 }
 0x39a   :  { %v2459_v2 = vpop.f32.mrf.mxu2 }
 0x39e   :  { %v1330_v51 = vpop.permute.xlu1 %1329 }
 0x39f   :  { %1724 = vmatmul.msk.f32.gmra.mxu1 %vm1112_vm4, %v1330_v51  ;;  %1740 = vmatmul.msk.f32.gmra.mxu2 %vm1112_vm4, %v1330_v51  ;;  %v1894_v51 = vld [vmem:[%s2575_s0 + $0x50] sm:$0xff] }
 0x3a6   :  { %v1338_v60 = vpop.permute.xlu2 %1337 }
 0x3a7   :  { %1725 = vmatmul.msk.f32.gmra.mxu1 %vm1112_vm4, %v1332_v53  ;;  %1741 = vmatmul.msk.f32.gmra.mxu2 %vm1112_vm4, %v1332_v53  ;;  %v1515_v53 = vmul.f32 %v1894_v51, %v2419_v43 }
 0x3ae   :  { %v1334_v55 = vpop.permute.xlu0 %1333 }
 0x3af   :  { %1726 = vmatmul.msk.f32.gmra.mxu1 %vm1112_vm4, %v1334_v55  ;;  %1742 = vmatmul.msk.f32.gmra.mxu2 %vm1112_vm4, %v1334_v55 }
 0x3b6   :  { %v1336_v57 = vpop.permute.xlu1 %1335 }
 0x3b7   :  { %1727 = vmatmul.msk.f32.gmra.mxu1 %vm1112_vm4, %v1336_v57  ;;  %1743 = vmatmul.msk.f32.gmra.mxu2 %vm1112_vm4, %v1336_v57 }
 0x3bf   :  { %1728 = vmatmul.msk.f32.gmra.mxu1 %vm1112_vm4, %v1338_v60  ;;  %1744 = vmatmul.msk.f32.gmra.mxu2 %vm1112_vm4, %v1338_v60  ;;  %v1895_v60 = vld [vmem:[%s2575_s0 + $0x58] sm:$0xff] }
 0x3c0   :  { %v1516_v61 = vmul.f32 %v1895_v60, %v1258_v27  ;;  %v1909_v60 = vld [vmem:[%s2575_s0 + $0xc8] sm:$0xff] }
 0x3c6   :  { %v1340_v62 = vpop.permute.xlu0 %1339 }
 0x3c7   :  { %1729 = vmatmul.msk.f32.gmra.mxu1 %vm1112_vm4, %v1340_v62  ;;  %1745 = vmatmul.msk.f32.gmra.mxu2 %vm1112_vm4, %v1340_v62 }
 0x3ce   :  { %v1342_v1 = vpop.permute.xlu1 %1341 }
 0x3cf   :  { %1730 = vmatmul.msk.f32.gmra.mxu1 %vm1112_vm4, %v1342_v1  ;;  %1746 = vmatmul.msk.f32.gmra.mxu2 %vm1112_vm4, %v1342_v1  ;;  %v1517_v1 = vmul.f32 %v1896_v0, %v2423_v45 }
 0x3d4   :  { %v1392_v6 = vpop.f32.mrf.mxu1 }
 0x3d5   :  { %v1537_v7 = vmul.f32 %v1505_v4, %v1392_v6  ;;  %v1267_v6 = vpop.f32.mrf.mxu0 }
 0x3d7   :  { %1569 = vst [vmem:[#allocation2] sm:$0xff] %v1537_v7  ;;  %v1897_v7 = vld [vmem:[%s2575_s0 + $0x68] sm:$0xff] }
 0x3d8   :  { %v1518_v8 = vmul.f32 %v1897_v7, %v1261_v42  ;;  %v1906_v42 = vld [vmem:[%s2575_s0 + $0xb0] sm:$0xff] }
 0x3da   :  { %v1457_v11 = vpop.f32.mrf.mxu2 }
 0x3db   :  { %v1538_v14 = vmul.f32 %v1506_v10, %v1457_v11  ;;  %v1898_v10 = vld [vmem:[%s2575_s0 + $0x70] sm:$0xff] }
 0x3dc   :  { %v1395_v15 = vpop.f32.mrf.mxu1  ;;  %v1519_v11 = vmul.f32 %v1898_v10, %v2427_v47 }
 0x3dd   :  { %1570 = vst [vmem:[#allocation2 + $0x8] sm:$0xff] %v1538_v14  ;;  %v1539_v5 = vmul.f32 %v1507_v13, %v1395_v15  ;;  %v1899_v14 = vld [vmem:[%s2575_s0 + $0x78] sm:$0xff] }
 0x3de   :  { %v1520_v15 = vmul.f32 %v1899_v14, %v1264_v58  ;;  %v1913_v14 = vld [vmem:[%s2575_s0 + $0xe8] sm:$0xff] }
 0x3df   :  { %1571 = vst [vmem:[#allocation2 + $0x10] sm:$0xff] %v1539_v5  ;;  %v1270_v5 = vpop.f32.mrf.mxu0 }
 0x3e2   :  { %v1460_v19 = vpop.f32.mrf.mxu2 }
 0x3e3   :  { %v1540_v23 = vmul.f32 %v1508_v18, %v1460_v19  ;;  %v1521_v18 = vmul.f32 %v1900_v17, %v2431_v49 }
 0x3e4   :  { %v1398_v20 = vpop.f32.mrf.mxu1 }
 0x3e5   :  { %1572 = vst [vmem:[#allocation2 + $0x18] sm:$0xff] %v1540_v23  ;;  %v1541_v24 = vmul.f32 %v1509_v22, %v1398_v20  ;;  %v1901_v22 = vld [vmem:[%s2575_s0 + $0x88] sm:$0xff] }
 0x3e6   :  { %v1522_v23 = vmul.f32 %v1901_v22, %v1267_v6  ;;  %v1911_v6 = vld [vmem:[%s2575_s0 + $0xd8] sm:$0xff] }
 0x3e7   :  { %1573 = vst [vmem:[#allocation2 + $0x20] sm:$0xff] %v1541_v24  ;;  %v1902_v24 = vld [vmem:[%s2575_s0 + $0x90] sm:$0xff]  ;;  %v1273_v27 = vpop.f32.mrf.mxu0 }
 0x3e8   :  { %v1523_v25 = vmul.f32 %v1902_v24, %v2437_v52 }
 0x3ea   :  { %v1463_v28 = vpop.f32.mrf.mxu2 }
 0x3eb   :  { %v1542_v31 = vmul.f32 %v1510_v26, %v1463_v28 }
 0x3ec   :  { %v1401_v32 = vpop.f32.mrf.mxu1 }
 0x3ed   :  { %1574 = vst [vmem:[#allocation2 + $0x28] sm:$0xff] %v1542_v31  ;;  %v1543_v33 = vmul.f32 %v1511_v30, %v1401_v32  ;;  %v1524_v30 = vmul.f32 %v1903_v29, %v1270_v5  ;;  %v1904_v32 = vld [vmem:[%s2575_s0 + $0xa0] sm:$0xff] }
 0x3ef   :  { %1575 = vst [vmem:[#allocation2 + $0x30] sm:$0xff] %v1543_v33  ;;  %v1525_v33 = vmul.f32 %v1904_v32, %v2441_v54 }
 0x3f2   :  { %v1466_v36 = vpop.f32.mrf.mxu2 }
 0x3f3   :  { %v1544_v40 = vmul.f32 %v1512_v35, %v1466_v36  ;;  %v1276_v36 = vpop.f32.mrf.mxu0 }
 0x3f4   :  { %v1404_v38 = vpop.f32.mrf.mxu1 }
 0x3f5   :  { %1576 = vst [vmem:[#allocation2 + $0x38] sm:$0xff] %v1544_v40  ;;  %v1545_v44 = vmul.f32 %v1513_v39, %v1404_v38  ;;  %v1526_v39 = vmul.f32 %v1905_v37, %v1273_v27  ;;  %v1527_v38 = vmul.f32 %v1906_v42, %v2445_v56 }
 0x3f7   :  { %1577 = vst [vmem:[#allocation2 + $0x40] sm:$0xff] %v1545_v44 }
 0x3fa   :  { %v1469_v50 = vpop.f32.mrf.mxu2 }
 0x3fb   :  { %v1546_v55 = vmul.f32 %v1514_v48, %v1469_v50  ;;  %v1279_v48 = vpop.f32.mrf.mxu0  ;;  %v1907_v50 = vld [vmem:[%s2575_s0 + $0xb8] sm:$0xff] }
 0x3fc   :  { %v1407_v41 = vpop.f32.mrf.mxu1  ;;  %v1528_v51 = vmul.f32 %v1907_v50, %v1276_v36 }
 0x3fd   :  { %1578 = vst [vmem:[#allocation2 + $0x48] sm:$0xff] %v1546_v55  ;;  %v1547_v57 = vmul.f32 %v1515_v53, %v1407_v41  ;;  %v1908_v55 = vld [vmem:[%s2575_s0 + $0xc0] sm:$0xff] }
 0x3fe   :  { %v1529_v41 = vmul.f32 %v1908_v55, %v2449_v59 }
 0x3ff   :  { %1579 = vst [vmem:[#allocation2 + $0x50] sm:$0xff] %v1547_v57 }
 0x402   :  { %v1472_v62 = vpop.f32.mrf.mxu2 }
 0x403   :  { %v1548_v3 = vmul.f32 %v1516_v61, %v1472_v62  ;;  %v1530_v61 = vmul.f32 %v1909_v60, %v1279_v48  ;;  %v1282_v62 = vpop.f32.mrf.mxu0 }
 0x404   :  { %v1410_v43 = vpop.f32.mrf.mxu1  ;;  %v1532_v7 = vmul.f32 %v1911_v6, %v1282_v62 }
 0x405   :  { %1580 = vst [vmem:[#allocation2 + $0x58] sm:$0xff] %v1548_v3  ;;  %v1549_v4 = vmul.f32 %v1517_v1, %v1410_v43  ;;  %v1910_v1 = vld [vmem:[%s2575_s0 + $0xd0] sm:$0xff] }
 0x406   :  { %v1531_v3 = vmul.f32 %v1910_v1, %v2455_v63 }
 0x407   :  { %1581 = vst [vmem:[#allocation2 + $0x60] sm:$0xff] %v1549_v4 }
 0x40a   :  { %v1475_v9 = vpop.f32.mrf.mxu2 }
 0x40b   :  { %v1550_v12 = vmul.f32 %v1518_v8, %v1475_v9  ;;  %v1912_v9 = vld [vmem:[%s2575_s0 + $0xe0] sm:$0xff] }
 0x40c   :  { %v1413_v45 = vpop.f32.mrf.mxu1  ;;  %v1533_v10 = vmul.f32 %v1912_v9, %v2459_v2 }
 0x40d   :  { %1582 = vst [vmem:[#allocation2 + $0x68] sm:$0xff] %v1550_v12  ;;  %v1551_v13 = vmul.f32 %v1519_v11, %v1413_v45  ;;  %v1285_v12 = vpop.f32.mrf.mxu0 }
 0x40f   :  { %1583 = vst [vmem:[#allocation2 + $0x70] sm:$0xff] %v1551_v13  ;;  %v1223_v13 = vpop.f32.mrf.mxu3 }
 0x412   :  { %v1478_v16 = vpop.f32.mrf.mxu2 }
 0x413   :  { %v1552_v19 = vmul.f32 %v1520_v15, %v1478_v16  ;;  %v1534_v15 = vmul.f32 %v1913_v14, %v1285_v12  ;;  %v1914_v16 = vld [vmem:[%s2575_s0 + $0xf0] sm:$0xff] }
 0x414   :  { %v1416_v47 = vpop.f32.mrf.mxu1  ;;  %v1535_v17 = vmul.f32 %v1914_v16, %v1223_v13 }
 0x415   :  { %1584 = vst [vmem:[#allocation2 + $0x78] sm:$0xff] %v1552_v19  ;;  %v1553_v21 = vmul.f32 %v1521_v18, %v1416_v47  ;;  %v1288_v47 = vpop.f32.mrf.mxu0 }
 0x417   :  { %1585 = vst [vmem:[#allocation2 + $0x80] sm:$0xff] %v1553_v21  ;;  %v1915_v21 = vld [vmem:[%s2575_s0 + $0xf8] sm:$0xff] }
 0x418   :  { %v1536_v22 = vmul.f32 %v1915_v21, %v1288_v47 }
 0x41a   :  { %v1481_v20 = vpop.f32.mrf.mxu2 }
 0x41b   :  { %v1554_v26 = vmul.f32 %v1522_v23, %v1481_v20 }
 0x41c   :  { %v1419_v49 = vpop.f32.mrf.mxu1 }
 0x41d   :  { %1586 = vst [vmem:[#allocation2 + $0x88] sm:$0xff] %v1554_v26  ;;  %v1555_v28 = vmul.f32 %v1523_v25, %v1419_v49 }
 0x41f   :  { %1587 = vst [vmem:[#allocation2 + $0x90] sm:$0xff] %v1555_v28 }
 0x422   :  { %v1484_v31 = vpop.f32.mrf.mxu2 }
 0x423   :  { %v1556_v34 = vmul.f32 %v1524_v30, %v1484_v31 }
 0x424   :  { %v1422_v52 = vpop.f32.mrf.mxu1 }
 0x425   :  { %1588 = vst [vmem:[#allocation2 + $0x98] sm:$0xff] %v1556_v34  ;;  %v1557_v35 = vmul.f32 %v1525_v33, %v1422_v52 }
 0x427   :  { %1589 = vst [vmem:[#allocation2 + $0xa0] sm:$0xff] %v1557_v35 }
 0x42a   :  { %v1487_v40 = vpop.f32.mrf.mxu2 }
 0x42b   :  { %v1558_v44 = vmul.f32 %v1526_v39, %v1487_v40 }
 0x42c   :  { %v1425_v54 = vpop.f32.mrf.mxu1 }
 0x42d   :  { %1590 = vst [vmem:[#allocation2 + $0xa8] sm:$0xff] %v1558_v44  ;;  %v1559_v46 = vmul.f32 %v1527_v38, %v1425_v54 }
 0x42f   :  { %1591 = vst [vmem:[#allocation2 + $0xb0] sm:$0xff] %v1559_v46 }
 0x432   :  { %v1490_v53 = vpop.f32.mrf.mxu2 }
 0x433   :  { %v1560_v57 = vmul.f32 %v1528_v51, %v1490_v53 }
 0x434   :  { %v1428_v56 = vpop.f32.mrf.mxu1 }
 0x435   :  { %1592 = vst [vmem:[#allocation2 + $0xb8] sm:$0xff] %v1560_v57  ;;  %v1561_v58 = vmul.f32 %v1529_v41, %v1428_v56 }
 0x437   :  { %1593 = vst [vmem:[#allocation2 + $0xc0] sm:$0xff] %v1561_v58 }
 0x43a   :  { %v1493_v0 = vpop.f32.mrf.mxu2 }
 0x43b   :  { %v1562_v43 = vmul.f32 %v1530_v61, %v1493_v0 }
 0x43c   :  { %v1431_v59 = vpop.f32.mrf.mxu1 }
 0x43d   :  { %1594 = vst [vmem:[#allocation2 + $0xc8] sm:$0xff] %v1562_v43  ;;  %v1563_v4 = vmul.f32 %v1531_v3, %v1431_v59 }
 0x43f   :  { %1595 = vst [vmem:[#allocation2 + $0xd0] sm:$0xff] %v1563_v4 }
 0x442   :  { %v1496_v8 = vpop.f32.mrf.mxu2 }
 0x443   :  { %v1564_v11 = vmul.f32 %v1532_v7, %v1496_v8 }
 0x444   :  { %v1434_v63 = vpop.f32.mrf.mxu1 }
 0x445   :  { %1596 = vst [vmem:[#allocation2 + $0xd8] sm:$0xff] %v1564_v11  ;;  %v1565_v45 = vmul.f32 %v1533_v10, %v1434_v63 }
 0x447   :  { %1597 = vst [vmem:[#allocation2 + $0xe0] sm:$0xff] %v1565_v45 }
 0x44a   :  { %v1499_v5 = vpop.f32.mrf.mxu2 }
 0x44b   :  { %v1566_v18 = vmul.f32 %v1534_v15, %v1499_v5 }
 0x44c   :  { %v1437_v2 = vpop.f32.mrf.mxu1 }
 0x44d   :  { %1598 = vst [vmem:[#allocation2 + $0xe8] sm:$0xff] %v1566_v18  ;;  %v1567_v19 = vmul.f32 %v1535_v17, %v1437_v2 }
 0x44f   :  { %1599 = vst [vmem:[#allocation2 + $0xf0] sm:$0xff] %v1567_v19 }
 0x452   :  { %v1502_v23 = vpop.f32.mrf.mxu2 }
 0x453   :  { %v1568_v20 = vmul.f32 %v1536_v22, %v1502_v23 }
 0x455   :  { %1600 = vst [vmem:[#allocation2 + $0xf8] sm:$0xff] %v1568_v20 }
 0x456   :  { %1613 = dma.vmem_to_hbm [thread:$0]  %s1606_s3, 4096, %s1608_s30, [#allocation3], %s1945_s10, %s1945_s10, %s1946_s11  }
 0x457   :  { %1940 = dma.done.wait [#allocation3], 4096  }
 0x458   :  { %1941 = vsyncadd [#allocation3], 4294963200 }
 0x459   :  { %1618 = vsyncpa [#allocation3], 1 }

</bundles_post_ra>
